<compile_context>
chip_gen: v7x
topology: tpu7x:2x2x1
jax: 0.10.0
libtpu: 0.0.40
codegen_flags: <defaults>
</compile_context>

<pallas_src>
import functools

import jax
import jax.numpy as jnp
from jax import lax
from jax.experimental import pallas as pl
from jax.experimental.pallas import tpu as pltpu


def _round_up(x, m):
    return ((x + m - 1) // m) * m


_INV_SQRT2 = 0.7071067811865476


def _gelu_exact(x):
    # PyTorch nn.GELU() default is the exact erf formulation.
    return 0.5 * x * (1.0 + lax.erf(x * _INV_SQRT2))


def _dino_head_kernel(x_ref, w1_ref, b1_ref, w2_ref, b2_ref, w3_ref, b3_ref,
                      wl_ref, o_ref, h_ref):
    # Grid = (batch tiles i, out_dim tiles j), j innermost. The MLP and the
    # L2-normalize run only at j == 0 and their result is cached in VMEM
    # scratch (h_ref) reused for every out_dim tile of the same batch tile.
    @pl.when(pl.program_id(1) == 0)
    def _():
        # bf16 MXU operands, f32 accumulation; elementwise math stays in f32.
        h = jnp.dot(x_ref[...], w1_ref[...], preferred_element_type=jnp.float32)
        h = _gelu_exact(h + b1_ref[...])
        h = jnp.dot(h.astype(jnp.bfloat16), w2_ref[...],
                    preferred_element_type=jnp.float32)
        h = _gelu_exact(h + b2_ref[...])
        h = jnp.dot(h.astype(jnp.bfloat16), w3_ref[...],
                    preferred_element_type=jnp.float32)
        h = h + b3_ref[...]
        # F.normalize(h, dim=-1, p=2) == h / max(||h||, 1e-12), via EUP rsqrt.
        # Padded rows/cols are exact zeros, so they do not perturb the norm.
        sumsq = jnp.sum(h * h, axis=-1, keepdims=True)
        h = h * lax.rsqrt(jnp.maximum(sumsq, 1e-24))
        h_ref[...] = h.astype(jnp.bfloat16)

    # Weight-normalized last linear (no bias), streamed over out_dim tiles.
    o_ref[...] = jnp.dot(h_ref[...], wl_ref[...],
                         preferred_element_type=jnp.float32).astype(o_ref.dtype)


@functools.partial(jax.jit, static_argnames=("block_b", "block_n"))
def dino_head_forward(x, params, *, block_b=128, block_n=512):
    """x: (B, in_dim) float32. params: dict of weights in PyTorch convention."""
    B, in_dim = x.shape
    w1, b1 = params["w1"], params["b1"]        # (hidden, in_dim), (hidden,)
    w2, b2 = params["w2"], params["b2"]        # (hidden, hidden), (hidden,)
    w3, b3 = params["w3"], params["b3"]        # (bottleneck, hidden), (bottleneck,)
    v, g = params["last_v"], params["last_g"]  # (out_dim, bottleneck), (out_dim, 1)

    hidden = w1.shape[0]
    bottleneck = w3.shape[0]
    out_dim = v.shape[0]

    # Lane-aligned (multiple-of-128) padded feature dims; batch / out_dim
    # padded up to their tile sizes so the grid divides exactly.
    in_p = _round_up(in_dim, 128)
    hid_p = _round_up(hidden, 128)
    bn_p = _round_up(bottleneck, 128)
    block_b = _round_up(min(block_b, _round_up(B, 8)), 8)
    b_p = _round_up(B, block_b)
    block_n = _round_up(min(block_n, _round_up(out_dim, 128)), 128)
    out_p = _round_up(out_dim, block_n)

    f32, bf16 = jnp.float32, jnp.bfloat16

    def pad2(a, rows, cols):
        return jnp.pad(a, ((0, rows - a.shape[0]), (0, cols - a.shape[1])))

    # --- plain-JAX glue: transpose + weight_norm + zero-pad + bf16 cast ---
    x_p = pad2(x.astype(f32), b_p, in_p).astype(bf16)
    w1_t = pad2(w1.astype(f32).T, in_p, hid_p).astype(bf16)    # (in_p, hid_p)
    w2_t = pad2(w2.astype(f32).T, hid_p, hid_p).astype(bf16)   # (hid_p, hid_p)
    w3_t = pad2(w3.astype(f32).T, hid_p, bn_p).astype(bf16)    # (hid_p, bn_p)
    v32 = v.astype(f32)
    v_row_norm = jnp.sqrt(jnp.sum(v32 * v32, axis=1, keepdims=True))
    wl_t = pad2((g.astype(f32) * v32 / v_row_norm).T, bn_p, out_p).astype(bf16)
    b1_p = pad2(b1.astype(f32).reshape(1, hidden), 1, hid_p)
    b2_p = pad2(b2.astype(f32).reshape(1, hidden), 1, hid_p)
    b3_p = pad2(b3.astype(f32).reshape(1, bottleneck), 1, bn_p)

    grid = (b_p // block_b, out_p // block_n)

    # Constant-index weight blocks: same block for every grid point, so Pallas
    # DMAs them once and keeps them resident.
    # TODO(synk): single-buffer these via pipeline_mode=pl.Buffered(1) once
    # verified on the target Pallas version (halves weight VMEM footprint for
    # the default hidden_dim=2048 configuration).
    const = lambda shape: pl.BlockSpec(shape, lambda i, j: (0, 0))

    # VMEM budget: double-buffered blocks + scratch + headroom.
    est = 2 * (block_b * in_p * 2 + in_p * hid_p * 2 + hid_p * hid_p * 2
               + hid_p * bn_p * 2 + bn_p * block_n * 2
               + (2 * hid_p + bn_p) * 4 + block_b * block_n * 4)
    est += block_b * bn_p * 2
    vmem_limit = int(min(max(est + (4 << 20), 32 << 20), 64 << 20))

    out_padded = pl.pallas_call(
        _dino_head_kernel,
        out_shape=jax.ShapeDtypeStruct((b_p, out_p), x.dtype),
        grid_spec=pltpu.PrefetchScalarGridSpec(
            num_scalar_prefetch=0,
            grid=grid,
            in_specs=[
                pl.BlockSpec((block_b, in_p), lambda i, j: (i, 0)),   # x tile
                const((in_p, hid_p)),                                 # w1^T
                const((1, hid_p)),                                    # b1
                const((hid_p, hid_p)),                                # w2^T
                const((1, hid_p)),                                    # b2
                const((hid_p, bn_p)),                                 # w3^T
                const((1, bn_p)),                                     # b3
                pl.BlockSpec((bn_p, block_n), lambda i, j: (0, j)),   # wl tile
            ],
            out_specs=pl.BlockSpec((block_b, block_n), lambda i, j: (i, j)),
            scratch_shapes=[pltpu.VMEM((block_b, bn_p), jnp.bfloat16)],
        ),
        compiler_params=pltpu.CompilerParams(
            dimension_semantics=("parallel", "arbitrary"),
            vmem_limit_bytes=vmem_limit),
    )(x_p, w1_t, b1_p, w2_t, b2_p, w3_t, b3_p, wl_t)

    return out_padded[:B, :out_dim]


def _trunc_normal(key, shape, std=0.02):
    # matches trunc_normal_(m.weight, std=0.02): N(0, std) truncated at +/- 2
    return std * jax.random.truncated_normal(key, -2.0, 2.0, shape, jnp.float32)


def init_dino_head_params(key, in_dim, out_dim, hidden_dim, bottleneck_dim):
    k1, k2, k3, k4 = jax.random.split(key, 4)
    return {
        "w1": _trunc_normal(k1, (hidden_dim, in_dim)),
        "b1": jnp.zeros((hidden_dim,), jnp.float32),
        "w2": _trunc_normal(k2, (hidden_dim, hidden_dim)),
        "b2": jnp.zeros((hidden_dim,), jnp.float32),
        "w3": _trunc_normal(k3, (bottleneck_dim, hidden_dim)),
        "b3": jnp.zeros((bottleneck_dim,), jnp.float32),
        # last_layer keeps its default init in the PyTorch module; any
        # deterministic init is fine for this synthetic test.
        "last_v": jax.random.normal(k4, (out_dim, bottleneck_dim), jnp.float32) * 0.05,
        "last_g": jnp.ones((out_dim, 1), jnp.float32),
    }


def _reference_forward(x, params):
    """Pure f32 JAX reference (exact-erf GELU, true weight_norm)."""
    w1, b1 = params["w1"], params["b1"]
    w2, b2 = params["w2"], params["b2"]
    w3, b3 = params["w3"], params["b3"]
    v, g = params["last_v"], params["last_g"]
    h = _gelu_exact(x @ w1.T + b1)
    h = _gelu_exact(h @ w2.T + b2)
    h = h @ w3.T + b3
    h = h / jnp.maximum(jnp.linalg.norm(h, axis=-1, keepdims=True), 1e-12)
    w_last = g * v / jnp.sqrt(jnp.sum(v * v, axis=1, keepdims=True))
    return h @ w_last.T


if __name__ == "__main__":
    # Small shapes consistent with the module; deliberately not all multiples
    # of the tile sizes to exercise the batch / feature padding paths.
    B, IN_DIM, HIDDEN, BOTTLENECK, OUT_DIM = 200, 192, 256, 128, 300

    key = jax.random.PRNGKey(0)
    kx, kp = jax.random.split(key)
    x = jax.random.normal(kx, (B, IN_DIM), jnp.float32)
    params = init_dino_head_params(kp, IN_DIM, OUT_DIM, HIDDEN, BOTTLENECK)

    # block_n=128 so the grid has several out_dim tiles (scratch reuse path).
    out = dino_head_forward(x, params, block_b=128, block_n=128)
    out = jax.block_until_ready(out)

    ref = _reference_forward(x, params)
    assert out.shape == (B, OUT_DIM)
    # bf16 MXU operands => relaxed tolerance vs the pure-f32 reference.
    assert jnp.allclose(out, ref, atol=2e-2, rtol=2e-2), "mismatch vs JAX reference"

    print("KERNEL_OK")
</pallas_src>

<mosaic_0001>
module attributes {stable_mosaic.version = 11 : i64} {
  func.func @_dino_head_kernel(%arg0: i32, %arg1: i32, %arg2: memref<128x256xbf16, #tpu.memory_space<vmem>>, %arg3: memref<256x256xbf16, #tpu.memory_space<vmem>>, %arg4: memref<1x256xf32, #tpu.memory_space<vmem>>, %arg5: memref<256x256xbf16, #tpu.memory_space<vmem>>, %arg6: memref<1x256xf32, #tpu.memory_space<vmem>>, %arg7: memref<256x128xbf16, #tpu.memory_space<vmem>>, %arg8: memref<1x128xf32, #tpu.memory_space<vmem>>, %arg9: memref<128x128xbf16, #tpu.memory_space<vmem>>, %arg10: memref<128x128xf32, #tpu.memory_space<vmem>>, %arg11: memref<128x128xbf16, #tpu.memory_space<vmem>>) attributes {dimension_semantics = [#tpu.dimension_semantics<parallel>, #tpu.dimension_semantics<arbitrary>], iteration_bounds = array<i64: 2, 3>, scalar_prefetch = 0 : i64, scratch_operands = 1 : i64, tpu.core_type = #tpu.core_type<tc>, window_params = [{transform_indices = @transform_0, window_bounds = array<i64: 128, 256>}, {pipeline_mode = #tpu.pipeline_mode<synchronous>, transform_indices = @transform_1, window_bounds = array<i64: 256, 256>}, {pipeline_mode = #tpu.pipeline_mode<synchronous>, transform_indices = @transform_2, window_bounds = array<i64: 1, 256>}, {pipeline_mode = #tpu.pipeline_mode<synchronous>, transform_indices = @transform_3, window_bounds = array<i64: 256, 256>}, {pipeline_mode = #tpu.pipeline_mode<synchronous>, transform_indices = @transform_4, window_bounds = array<i64: 1, 256>}, {pipeline_mode = #tpu.pipeline_mode<synchronous>, transform_indices = @transform_5, window_bounds = array<i64: 256, 128>}, {pipeline_mode = #tpu.pipeline_mode<synchronous>, transform_indices = @transform_6, window_bounds = array<i64: 1, 128>}, {transform_indices = @transform_7, window_bounds = array<i64: 128, 128>}, {transform_indices = @transform_8, window_bounds = array<i64: 128, 128>}]} {
    %c0_i32 = arith.constant 0 : i32
    %0 = arith.cmpi eq, %arg1, %c0_i32 : i32
    %1 = arith.extui %0 : i1 to i32
    %c0_i32_0 = arith.constant 0 : i32
    %2 = arith.cmpi ne, %1, %c0_i32_0 : i32
    scf.if %2 {
      %c0_6 = arith.constant 0 : index
      %c0_7 = arith.constant 0 : index
      %7 = vector.load %arg2[%c0_6, %c0_7] : memref<128x256xbf16, #tpu.memory_space<vmem>>, vector<128x256xbf16>
      %c0_8 = arith.constant 0 : index
      %c0_9 = arith.constant 0 : index
      %8 = vector.load %arg3[%c0_8, %c0_9] : memref<256x256xbf16, #tpu.memory_space<vmem>>, vector<256x256xbf16>
      %cst_10 = arith.constant dense<0.000000e+00> : vector<128x256xf32>
      %9 = tpu.matmul %7, %8, %cst_10 {dimension_numbers = #tpu.dot_dimension_numbers<[1], [0], [0], [1], [0, 0, 1, 1], [], []>} : vector<128x256xbf16>, vector<256x256xbf16>, vector<128x256xf32> -> vector<128x256xf32>
      %c0_11 = arith.constant 0 : index
      %c0_12 = arith.constant 0 : index
      %10 = vector.load %arg4[%c0_11, %c0_12] : memref<1x256xf32, #tpu.memory_space<vmem>>, vector<1x256xf32>
      %11 = vector.broadcast %10 : vector<1x256xf32> to vector<128x256xf32>
      %12 = arith.addf %9, %11 : vector<128x256xf32>
      %cst_13 = arith.constant 5.000000e-01 : f32
      %13 = vector.broadcast %cst_13 : f32 to vector<128x256xf32>
      %14 = arith.mulf %13, %12 : vector<128x256xf32>
      %cst_14 = arith.constant 0.707106769 : f32
      %15 = vector.broadcast %cst_14 : f32 to vector<128x256xf32>
      %16 = arith.mulf %12, %15 : vector<128x256xf32>
      %17 = math.erf %16 : vector<128x256xf32>
      %cst_15 = arith.constant 1.000000e+00 : f32
      %18 = vector.broadcast %cst_15 : f32 to vector<128x256xf32>
      %19 = arith.addf %18, %17 : vector<128x256xf32>
      %20 = arith.mulf %14, %19 : vector<128x256xf32>
      %21 = arith.truncf %20 : vector<128x256xf32> to vector<128x256xbf16>
      %c0_16 = arith.constant 0 : index
      %c0_17 = arith.constant 0 : index
      %22 = vector.load %arg5[%c0_16, %c0_17] : memref<256x256xbf16, #tpu.memory_space<vmem>>, vector<256x256xbf16>
      %cst_18 = arith.constant dense<0.000000e+00> : vector<128x256xf32>
      %23 = tpu.matmul %21, %22, %cst_18 {dimension_numbers = #tpu.dot_dimension_numbers<[1], [0], [0], [1], [0, 0, 1, 1], [], []>} : vector<128x256xbf16>, vector<256x256xbf16>, vector<128x256xf32> -> vector<128x256xf32>
      %c0_19 = arith.constant 0 : index
      %c0_20 = arith.constant 0 : index
      %24 = vector.load %arg6[%c0_19, %c0_20] : memref<1x256xf32, #tpu.memory_space<vmem>>, vector<1x256xf32>
      %25 = vector.broadcast %24 : vector<1x256xf32> to vector<128x256xf32>
      %26 = arith.addf %23, %25 : vector<128x256xf32>
      %cst_21 = arith.constant 5.000000e-01 : f32
      %27 = vector.broadcast %cst_21 : f32 to vector<128x256xf32>
      %28 = arith.mulf %27, %26 : vector<128x256xf32>
      %cst_22 = arith.constant 0.707106769 : f32
      %29 = vector.broadcast %cst_22 : f32 to vector<128x256xf32>
      %30 = arith.mulf %26, %29 : vector<128x256xf32>
      %31 = math.erf %30 : vector<128x256xf32>
      %cst_23 = arith.constant 1.000000e+00 : f32
      %32 = vector.broadcast %cst_23 : f32 to vector<128x256xf32>
      %33 = arith.addf %32, %31 : vector<128x256xf32>
      %34 = arith.mulf %28, %33 : vector<128x256xf32>
      %35 = arith.truncf %34 : vector<128x256xf32> to vector<128x256xbf16>
      %c0_24 = arith.constant 0 : index
      %c0_25 = arith.constant 0 : index
      %36 = vector.load %arg7[%c0_24, %c0_25] : memref<256x128xbf16, #tpu.memory_space<vmem>>, vector<256x128xbf16>
      %cst_26 = arith.constant dense<0.000000e+00> : vector<128x128xf32>
      %37 = tpu.matmul %35, %36, %cst_26 {dimension_numbers = #tpu.dot_dimension_numbers<[1], [0], [0], [1], [0, 0, 1, 1], [], []>} : vector<128x256xbf16>, vector<256x128xbf16>, vector<128x128xf32> -> vector<128x128xf32>
      %c0_27 = arith.constant 0 : index
      %c0_28 = arith.constant 0 : index
      %38 = vector.load %arg8[%c0_27, %c0_28] : memref<1x128xf32, #tpu.memory_space<vmem>>, vector<1x128xf32>
      %39 = vector.broadcast %38 : vector<1x128xf32> to vector<128x128xf32>
      %40 = arith.addf %37, %39 : vector<128x128xf32>
      %41 = arith.mulf %40, %40 : vector<128x128xf32>
      %cst_29 = arith.constant dense<0.000000e+00> : vector<128xf32>
      %42 = vector.multi_reduction <add>, %41, %cst_29 [1] : vector<128x128xf32> to vector<128xf32>
      %43 = vector.shape_cast %42 : vector<128xf32> to vector<128x1xf32>
      %cst_30 = arith.constant 1.000000e-24 : f32
      %44 = vector.broadcast %cst_30 : f32 to vector<128x1xf32>
      %45 = arith.maximumf %43, %44 : vector<128x1xf32>
      %46 = math.rsqrt %45 : vector<128x1xf32>
      %47 = vector.broadcast %46 : vector<128x1xf32> to vector<128x128xf32>
      %48 = arith.mulf %40, %47 : vector<128x128xf32>
      %49 = arith.truncf %48 : vector<128x128xf32> to vector<128x128xbf16>
      %c0_31 = arith.constant 0 : index
      %c0_32 = arith.constant 0 : index
      %50 = vector.load %arg11[%c0_31, %c0_32] : memref<128x128xbf16, #tpu.memory_space<vmem>>, vector<128x128xbf16>
      tpu.vector_store %arg11[%c0_31, %c0_32], %49 {strides = array<i32>} : memref<128x128xbf16, #tpu.memory_space<vmem>>, vector<128x128xbf16>,
    } else {
    }
    %c0 = arith.constant 0 : index
    %c0_1 = arith.constant 0 : index
    %3 = vector.load %arg11[%c0, %c0_1] : memref<128x128xbf16, #tpu.memory_space<vmem>>, vector<128x128xbf16>
    %c0_2 = arith.constant 0 : index
    %c0_3 = arith.constant 0 : index
    %4 = vector.load %arg9[%c0_2, %c0_3] : memref<128x128xbf16, #tpu.memory_space<vmem>>, vector<128x128xbf16>
    %cst = arith.constant dense<0.000000e+00> : vector<128x128xf32>
    %5 = tpu.matmul %3, %4, %cst {dimension_numbers = #tpu.dot_dimension_numbers<[1], [0], [0], [1], [0, 0, 1, 1], [], []>} : vector<128x128xbf16>, vector<128x128xbf16>, vector<128x128xf32> -> vector<128x128xf32>
    %c0_4 = arith.constant 0 : index
    %c0_5 = arith.constant 0 : index
    %6 = vector.load %arg10[%c0_4, %c0_5] : memref<128x128xf32, #tpu.memory_space<vmem>>, vector<128x128xf32>
    tpu.vector_store %arg10[%c0_4, %c0_5], %5 {strides = array<i32>} : memref<128x128xf32, #tpu.memory_space<vmem>>, vector<128x128xf32>,
    return
  }
  func.func @transform_0(%arg0: i32, %arg1: i32) -> (i32, i32) {
    %c0_i32 = arith.constant 0 : i32
    %c0_i32_0 = arith.constant 0 : i32
    return %arg0, %c0_i32 : i32, i32
  }
  func.func @transform_1(%arg0: i32, %arg1: i32) -> (i32, i32) {
    %c0_i32 = arith.constant 0 : i32
    %c0_i32_0 = arith.constant 0 : i32
    %c0_i32_1 = arith.constant 0 : i32
    return %c0_i32, %c0_i32_0 : i32, i32
  }
  func.func @transform_2(%arg0: i32, %arg1: i32) -> (i32, i32) {
    %c0_i32 = arith.constant 0 : i32
    %c0_i32_0 = arith.constant 0 : i32
    %c0_i32_1 = arith.constant 0 : i32
    return %c0_i32, %c0_i32_0 : i32, i32
  }
  func.func @transform_3(%arg0: i32, %arg1: i32) -> (i32, i32) {
    %c0_i32 = arith.constant 0 : i32
    %c0_i32_0 = arith.constant 0 : i32
    %c0_i32_1 = arith.constant 0 : i32
    return %c0_i32, %c0_i32_0 : i32, i32
  }
  func.func @transform_4(%arg0: i32, %arg1: i32) -> (i32, i32) {
    %c0_i32 = arith.constant 0 : i32
    %c0_i32_0 = arith.constant 0 : i32
    %c0_i32_1 = arith.constant 0 : i32
    return %c0_i32, %c0_i32_0 : i32, i32
  }
  func.func @transform_5(%arg0: i32, %arg1: i32) -> (i32, i32) {
    %c0_i32 = arith.constant 0 : i32
    %c0_i32_0 = arith.constant 0 : i32
    %c0_i32_1 = arith.constant 0 : i32
    return %c0_i32, %c0_i32_0 : i32, i32
  }
  func.func @transform_6(%arg0: i32, %arg1: i32) -> (i32, i32) {
    %c0_i32 = arith.constant 0 : i32
    %c0_i32_0 = arith.constant 0 : i32
    %c0_i32_1 = arith.constant 0 : i32
    return %c0_i32, %c0_i32_0 : i32, i32
  }
  func.func @transform_7(%arg0: i32, %arg1: i32) -> (i32, i32) {
    %c0_i32 = arith.constant 0 : i32
    %c0_i32_0 = arith.constant 0 : i32
    return %c0_i32, %arg1 : i32, i32
  }
  func.func @transform_8(%arg0: i32, %arg1: i32) -> (i32, i32) {
    %c0_i32 = arith.constant 0 : i32
    return %arg0, %arg1 : i32, i32
  }
}

</mosaic_0001>

<bundles_post_ra>
// kernel: dino_head_forward.1
= control target key start
LH: loop header
LB: loop body
LE: loop exit
PB: predicated region body
PF: predicated region fallthrough
CT: control target
= control target key end

     0   :  { %s3780_s0 = inlined_call_operand.vmem [shape: bf16[256,256], index: 0, kind: input, shape index: {}]   ;;  %s3781_s1 = inlined_call_operand.vmem [shape: bf16[256,256], index: 1, kind: input, shape index: {}]   ;;  %s3782_s2 = inlined_call_operand.vmem [shape: f32[1,256], index: 2, kind: input, shape index: {}]   ;;  %s3783_s3 = inlined_call_operand.vmem [shape: bf16[256,256], index: 3, kind: input, shape index: {}]   ;;  %s3784_s4 = inlined_call_operand.vmem [shape: f32[1,256], index: 4, kind: input, shape index: {}]   ;;  %s3785_s5 = inlined_call_operand.vmem [shape: bf16[256,128], index: 5, kind: input, shape index: {}]   ;;  %s3786_s6 = inlined_call_operand.vmem [shape: f32[1,128], index: 6, kind: input, shape index: {}]   ;;  %s3787_s7 = inlined_call_operand.vmem [shape: bf16[128,384], index: 7, kind: input, shape index: {}]   ;;  %s3788_s8 = inlined_call_operand.vmem [shape: f32[256,384], index: 8, kind: output, shape index: {}]  }
   0x1   :  { %3791 = sst [smem:[#allocation7_spill]] %s3787_s7 }
   0x2   :  { %s3006_s27 = smov 0   ;;  %s3008_s28 = smov 0  }
   0x3   :  { %s3010_s29 = smov 0   ;;  %s3012_s30 = smov 0  }
   0x4   :  { %s3014_s9 = smov 0   ;;  %s3016_s10 = smov 0  }
   0x5   :  { %s3018_s11 = smov 0   ;;  %s3020_s12 = smov 0  }
   0x6   :  { %s3022_s13 = smov 0  }
   0x7 LB: > { %s2243_s14 = sadd.s32 4294967295, %s2959_s13   ;;  %s27_s15 = sadd.s32 1, %s2951_s11  ;;  %s2959_s13 = sphi %s3022_s13, %s18_s13   ;;  %s2955_s12 = sphi %s3020_s12, %s3805_s12   ;;  %s2951_s11 = sphi %s3018_s11, %s3804_s11   ;;  %s2947_s10 = sphi %s3016_s10, %s3803_s10   ;;  %s2943_s9 = sphi %s3014_s9, %s3802_s9   ;;  %s2939_s30 = sphi %s3012_s30, %s3801_s30   ;;  %s2935_s29 = sphi %s3010_s29, %s3800_s29   ;;  %s2931_s28 = sphi %s3008_s28, %s3799_s28   ;;  %s2927_s27 = sphi %s3006_s27, %s3798_s27  }
   0x8   : > { %p28_p0 = scmp.ge.s32.totalorder %s27_s15, 3  ;;  %s30_s16 = sadd.s32 1, %s2955_s12 }
   0x9   : > { %s189_s17 = sadd.s32 1, %s2939_s30  ;;  %p196_p1 = scmp.ne.s32.totalorder %s2939_s30, %s2935_s29 }
   0xa   : > { %s3807_s15 = smov (%p28_p0, %s27_s15), 0  ;;  %s3809_s16 = smov (!%p28_p0, %s30_s16), %s2955_s12 }
   0xb   : > { %3792 = sst [smem:[#allocation5_spill]] %s3807_s15  ;;  %s186_s18 = ssub.s32 %s2951_s11, %s3807_s15 }
   0xc   : > { %p197_p2 = scmp.eq.s32.totalorder %s2959_s13, 0  ;;  %p32_p3 = scmp.ge.s32.totalorder %s3809_s16, 2 }
   0xd   : > { %p187_p4 = scmp.eq.s32.totalorder %s186_s18, 0  ;;  %s217_s19 = sadd.s32 1, %s2931_s28 }
   0xe   : > { %p198_p5 = por %p197_p2, %p196_p1  ;;  %s3811_s16 = smov (%p32_p3, %s3809_s16), 0 }
   0xf   : > { %3793 = sst [smem:[#allocation6_spill]] %s3811_s16  ;;  %s212_s21 = ssub.s32 %s2955_s12, %s3811_s16 }
  0x10   : > { %s3067_s20 = scalar_select %p187_p4, %s2939_s30, %s189_s17  }
  0x11   : > { %p227_p6 = scmp.ne.s32.totalorder %s2931_s28, %s2927_s27  ;;  %s214_s22 = sor.u32 %s212_s21, %s186_s18 }
  0x12   : > { %p228_p7 = scmp.eq.s32.totalorder %s2243_s14, 5  ;;  %p215_p8 = scmp.eq.s32.totalorder %s214_s22, 0 }
  0x13   : > { %p2246_p10 = scmp.ge.s32.totalorder %s2959_s13, 6 }
  0x14   : > { %p3073_p9 = por %p228_p7, %p227_p6 }
  0x15   : > { %s3078_s24 = scalar_select %p215_p8, %s2931_s28, %s217_s19  }
  0x16   : > { %268 = sbr.rel (%p2246_p10) target bundleno = 49 (0x31), region = 40 }
  0x1d   : > { %281 = sbr.rel (!%p198_p5) target bundleno = 49 (0x31), region = 48  ;;  %s283_s25 = sand.u32 (%p198_p5), 1, %s2939_s30  }
  0x1e   : > { %s2248_s26 = sshll.u32 (%p198_p5), %s2951_s11, 2  ;;  %s2247_s17 = sshll.u32 (%p198_p5), %s283_s25, 6 }
  0x1f   : > { %s3795_s7 = sld [smem:[#allocation7_spill]] (%p198_p5)  ;;  %s285_s18 = scalar_lea.vmem (%p198_p5), [#allocation3], %s2247_s17 }
  0x25   : > { %s3086_s14 = scalar_lea.vmem %s3795_s7, %s2248_s26 }
  0x26   : > { %v303_v0 = vld [vmem:[%s3086_s14] sm:$0xf]  ;;  %v305_v1 = vld [vmem:[%s3086_s14 + $0xc] sm:$0xf]  ;;  %v307_v2 = vld [vmem:[%s3086_s14 + $0x18] sm:$0xf] }
  0x27   : > { %304 = vst [vmem:[%s285_s18] sm:$0xf] %v303_v0  ;;  %306 = vst [vmem:[%s285_s18 + $0x4] sm:$0xf] %v305_v1  ;;  %v309_v3 = vld [vmem:[%s3086_s14 + $0x24] sm:$0xf] }
  0x28   : > { %v311_v4 = vld [vmem:[%s3086_s14 + $0x30] sm:$0xf]  ;;  %308 = vst [vmem:[%s285_s18 + $0x8] sm:$0xf] %v307_v2  ;;  %310 = vst [vmem:[%s285_s18 + $0xc] sm:$0xf] %v309_v3 }
  0x29   : > { %312 = vst [vmem:[%s285_s18 + $0x10] sm:$0xf] %v311_v4  ;;  %v313_v5 = vld [vmem:[%s3086_s14 + $0x3c] sm:$0xf]  ;;  %v315_v6 = vld [vmem:[%s3086_s14 + $0x48] sm:$0xf] }
  0x2a   : > { %v317_v7 = vld [vmem:[%s3086_s14 + $0x54] sm:$0xf]  ;;  %314 = vst [vmem:[%s285_s18 + $0x14] sm:$0xf] %v313_v5  ;;  %316 = vst [vmem:[%s285_s18 + $0x18] sm:$0xf] %v315_v6 }
  0x2b   : > { %318 = vst [vmem:[%s285_s18 + $0x1c] sm:$0xf] %v317_v7  ;;  %v319_v8 = vld [vmem:[%s3086_s14 + $0x60] sm:$0xf]  ;;  %v321_v9 = vld [vmem:[%s3086_s14 + $0x6c] sm:$0xf] }
  0x2c   : > { %v323_v10 = vld [vmem:[%s3086_s14 + $0x78] sm:$0xf]  ;;  %320 = vst [vmem:[%s285_s18 + $0x20] sm:$0xf] %v319_v8  ;;  %322 = vst [vmem:[%s285_s18 + $0x24] sm:$0xf] %v321_v9 }
  0x2d   : > { %324 = vst [vmem:[%s285_s18 + $0x28] sm:$0xf] %v323_v10  ;;  %v325_v11 = vld [vmem:[%s3086_s14 + $0x84] sm:$0xf]  ;;  %v327_v12 = vld [vmem:[%s3086_s14 + $0x90] sm:$0xf] }
  0x2e   : > { %v329_v13 = vld [vmem:[%s3086_s14 + $0x9c] sm:$0xf]  ;;  %326 = vst [vmem:[%s285_s18 + $0x2c] sm:$0xf] %v325_v11  ;;  %328 = vst [vmem:[%s285_s18 + $0x30] sm:$0xf] %v327_v12 }
  0x2f   : > { %330 = vst [vmem:[%s285_s18 + $0x34] sm:$0xf] %v329_v13  ;;  %v331_v14 = vld [vmem:[%s3086_s14 + $0xa8] sm:$0xf]  ;;  %v333_v15 = vld [vmem:[%s3086_s14 + $0xb4] sm:$0xf] }
  0x30   : > { %332 = vst [vmem:[%s285_s18 + $0x38] sm:$0xf] %v331_v14  ;;  %334 = vst [vmem:[%s285_s18 + $0x3c] sm:$0xf] %v333_v15 }
  0x31 PF: > { %p2249_p11 = scmp.ge.s32.totalorder %s2959_s13, 1  ;;  %p388_p12 = scmp.lt.s32.totalorder %s2959_s13, 7 }
  0x33   : > { %p389_p13 = pnand %p2249_p11, %p388_p12 }
  0x34   : > { %s395_s15 = sand.u32 (!%p389_p13), 1, %s2935_s29   ;;  %s430_s16 = sand.u32 (!%p389_p13), 1, %s2927_s27  }
  0x35   : > { %392 = sbr.rel (%p389_p13) target bundleno = 1303 (0x517), region = 89  ;;  %s2250_s19 = sshll.u32 (!%p389_p13), %s395_s15, 6 }
  0x36   : > { %s2251_s21 = sshll.u32 (!%p389_p13), %s430_s16, 7  ;;  %s2252_s22 = sshll.u32 (!%p389_p13), %s2947_s10, 4 }
  0x37   : > { %p434_p0 = scmp.lt.s32.totalorder (!%p389_p13), %s2252_s22, 31  ;;  %s3114_s18 = scalar_lea.vmem (!%p389_p13), [#allocation3], %s2250_s19 }
  0x38   : > { %s3116_s7 = scalar_lea.vmem (!%p389_p13), [#allocation4], %s2251_s21  ;;  %p2255_p1 = scmp.ne.s32.totalorder (!%p389_p13), %s2943_s9, 0 }
  0x3c   : > { %s3813_s22 = smov (!%p434_p0, %s2252_s22), 31  ;;  %445 = sbr.rel (%p2255_p1) target bundleno = 1037 (0x40d), region = 97 }
  0x3d   : > { %s2367_s25 = sshll.u32 %s3813_s22, 3  ;;  %v2585_v16 = vld [vmem:[%s3781_s1 + $0x4] ss:$8 sps:$4 sm:$0xff] (!%p2255_p1)   ;;  %v2587_v17 = vld [vmem:[%s3781_s1] ss:$8 sps:$4 sm:$0xff] (!%p2255_p1)  }
  0x3e   : > { %s3112_s14 = scalar_lea.vmem %s3780_s0, %s2367_s25  ;;  %746 = vmatprep.subr.bf16.mxu0 (!%p2255_p1), %v2585_v16  ;;  %v2588_v18 = vld [vmem:[%s3781_s1 + $0x14] ss:$8 sps:$4 sm:$0xff] (!%p2255_p1)   ;;  %v2590_v19 = vld [vmem:[%s3781_s1 + $0x10] ss:$8 sps:$4 sm:$0xff] (!%p2255_p1)   ;;  %v2591_v20 = vld [vmem:[%s3781_s1 + $0x24] ss:$8 sps:$4 sm:$0xff] (!%p2255_p1)  }
  0x3f   : > { %747 = vmatpush1.bf16.msra.mxu0 (!%p2255_p1), %v2587_v17  ;;  %v2593_v21 = vld [vmem:[%s3781_s1 + $0x20] ss:$8 sps:$4 sm:$0xff] (!%p2255_p1)   ;;  %v2594_v22 = vld [vmem:[%s3781_s1 + $0x34] ss:$8 sps:$4 sm:$0xff] (!%p2255_p1)   ;;  %v2596_v23 = vld [vmem:[%s3781_s1 + $0x30] ss:$8 sps:$4 sm:$0xff] (!%p2255_p1)  }
  0x40   : > { %748 = vmatprep.subr.bf16.mxu0 (!%p2255_p1), %v2588_v18  ;;  %v2597_v24 = vld [vmem:[%s3781_s1 + $0x44] ss:$8 sps:$4 sm:$0xff] (!%p2255_p1)   ;;  %v2599_v25 = vld [vmem:[%s3781_s1 + $0x40] ss:$8 sps:$4 sm:$0xff] (!%p2255_p1)   ;;  %v2600_v26 = vld [vmem:[%s3781_s1 + $0x54] ss:$8 sps:$4 sm:$0xff] (!%p2255_p1)  }
  0x41   : > { %v2602_v27 = vld [vmem:[%s3781_s1 + $0x50] ss:$8 sps:$4 sm:$0xff] (!%p2255_p1)   ;;  %v2603_v28 = vld [vmem:[%s3781_s1 + $0x64] ss:$8 sps:$4 sm:$0xff] (!%p2255_p1)   ;;  %v2605_v30 = vld [vmem:[%s3781_s1 + $0x60] ss:$8 sps:$4 sm:$0xff] (!%p2255_p1)  }
  0x42   : > { %v2635_v29 = vld [vmem:[%s3112_s14 + $0x4] ss:$8 sps:$4 sm:$0xff] (!%p2255_p1)   ;;  %v2606_v31 = vld [vmem:[%s3781_s1 + $0x74] ss:$8 sps:$4 sm:$0xff] (!%p2255_p1)   ;;  %v2608_v32 = vld [vmem:[%s3781_s1 + $0x70] ss:$8 sps:$4 sm:$0xff] (!%p2255_p1)  }
  0x43   : > { %749 = vmatpush1.bf16.msra.mxu0 %v2590_v19  ;;  %778 = vmatprep.mubr.bf16.mxu0 %v2635_v29  ;;  %v2609_v33 = vld [vmem:[%s3781_s1 + $0x84] ss:$8 sps:$4 sm:$0xff]   ;;  %v2611_v34 = vld [vmem:[%s3781_s1 + $0x80] ss:$8 sps:$4 sm:$0xff]   ;;  %v2612_v35 = vld [vmem:[%s3781_s1 + $0x94] ss:$8 sps:$4 sm:$0xff]  }
  0x44   : > { %750 = vmatprep.subr.bf16.mxu0 %v2591_v20  ;;  %v2657_v36 = vld [vmem:[%s3783_s3 + $0x4] ss:$8 sps:$4 sm:$0xff]   ;;  %v2659_v37 = vld [vmem:[%s3783_s3] ss:$8 sps:$4 sm:$0xff]   ;;  %v2614_v38 = vld [vmem:[%s3781_s1 + $0x90] ss:$8 sps:$4 sm:$0xff]  }
  0x45   : > { %1239 = vmatprep.subr.bf16.mxu1 %v2657_v36  ;;  %v2660_v39 = vld [vmem:[%s3783_s3 + $0x14] ss:$8 sps:$4 sm:$0xff]   ;;  %v2615_v40 = vld [vmem:[%s3781_s1 + $0xa4] ss:$8 sps:$4 sm:$0xff]   ;;  %v2662_v41 = vld [vmem:[%s3783_s3 + $0x10] ss:$8 sps:$4 sm:$0xff]  }
  0x46   : > { %1240 = vmatpush1.bf16.msra.mxu1 %v2659_v37  ;;  %v2663_v42 = vld [vmem:[%s3783_s3 + $0x24] ss:$8 sps:$4 sm:$0xff]   ;;  %v2617_v43 = vld [vmem:[%s3781_s1 + $0xa0] ss:$8 sps:$4 sm:$0xff]   ;;  %v2618_v44 = vld [vmem:[%s3781_s1 + $0xb4] ss:$8 sps:$4 sm:$0xff]  }
  0x47   : > { %751 = vmatpush1.bf16.msra.mxu0 %v2593_v21  ;;  %1241 = vmatprep.subr.bf16.mxu1 %v2660_v39  ;;  %v2665_v45 = vld [vmem:[%s3783_s3 + $0x20] ss:$8 sps:$4 sm:$0xff]   ;;  %v2666_v46 = vld [vmem:[%s3783_s3 + $0x34] ss:$8 sps:$4 sm:$0xff]   ;;  %v2620_v47 = vld [vmem:[%s3781_s1 + $0xb0] ss:$8 sps:$4 sm:$0xff]  }
  0x48   : > { %752 = vmatprep.subr.bf16.mxu0 %v2594_v22  ;;  %v2621_v48 = vld [vmem:[%s3781_s1 + $0xc4] ss:$8 sps:$4 sm:$0xff]   ;;  %v2668_v49 = vld [vmem:[%s3783_s3 + $0x30] ss:$8 sps:$4 sm:$0xff]   ;;  %v2623_v51 = vld [vmem:[%s3781_s1 + $0xc0] ss:$8 sps:$4 sm:$0xff]  }
  0x49   : > { %v2669_v50 = vld [vmem:[%s3783_s3 + $0x44] ss:$8 sps:$4 sm:$0xff]   ;;  %v2671_v52 = vld [vmem:[%s3783_s3 + $0x40] ss:$8 sps:$4 sm:$0xff]   ;;  %v2624_v53 = vld [vmem:[%s3781_s1 + $0xd4] ss:$8 sps:$4 sm:$0xff]  }
  0x4a   : > { %1242 = vmatpush1.bf16.msra.mxu1 %v2662_v41  ;;  %v2672_v54 = vld [vmem:[%s3783_s3 + $0x54] ss:$8 sps:$4 sm:$0xff]   ;;  %v2626_v55 = vld [vmem:[%s3781_s1 + $0xd0] ss:$8 sps:$4 sm:$0xff]   ;;  %v2627_v57 = vld [vmem:[%s3781_s1 + $0xe4] ss:$8 sps:$4 sm:$0xff]  }
  0x4b   : > { %753 = vmatpush1.bf16.msra.mxu0 %v2596_v23  ;;  %1243 = vmatprep.subr.bf16.mxu1 %v2663_v42  ;;  %v2674_v56 = vld [vmem:[%s3783_s3 + $0x50] ss:$8 sps:$4 sm:$0xff]   ;;  %v2675_v58 = vld [vmem:[%s3783_s3 + $0x64] ss:$8 sps:$4 sm:$0xff]   ;;  %v2629_v59 = vld [vmem:[%s3781_s1 + $0xe0] ss:$8 sps:$4 sm:$0xff]  }
  0x4c   : > { %754 = vmatprep.subr.bf16.mxu0 %v2597_v24  ;;  %v2677_v60 = vld [vmem:[%s3783_s3 + $0x60] ss:$8 sps:$4 sm:$0xff]   ;;  %v2630_v61 = vld [vmem:[%s3781_s1 + $0xf4] ss:$8 sps:$4 sm:$0xff]   ;;  %v2632_v63 = vld [vmem:[%s3781_s1 + $0xf0] ss:$8 sps:$4 sm:$0xff]  }
  0x4d   : > { %v2678_v62 = vld [vmem:[%s3783_s3 + $0x74] ss:$8 sps:$4 sm:$0xff]   ;;  %v2680_v0 = vld [vmem:[%s3783_s3 + $0x70] ss:$8 sps:$4 sm:$0xff]   ;;  %v2681_v1 = vld [vmem:[%s3783_s3 + $0x84] ss:$8 sps:$4 sm:$0xff]  }
  0x4e   : > { %1244 = vmatpush1.bf16.msra.mxu1 %v2665_v45  ;;  %v2633_v2 = vld [vmem:[%s3112_s14] ss:$8 sps:$4 sm:$0xff]   ;;  %v2636_v3 = vld [vmem:[%s3112_s14 + $0x14] ss:$8 sps:$4 sm:$0xff]   ;;  %v2686_v6 = vld [vmem:[%s3783_s3 + $0x90] ss:$8 sps:$4 sm:$0xff]  }
  0x4f   : > { %755 = vmatpush1.bf16.msra.mxu0 %v2599_v25  ;;  %1245 = vmatprep.subr.bf16.mxu1 %v2666_v46  ;;  %v2683_v4 = vld [vmem:[%s3783_s3 + $0x80] ss:$8 sps:$4 sm:$0xff]   ;;  %v2684_v5 = vld [vmem:[%s3783_s3 + $0x94] ss:$8 sps:$4 sm:$0xff]   ;;  %v2638_v7 = vld [vmem:[%s3112_s14 + $0x10] ss:$8 sps:$4 sm:$0xff]  }
  0x50   : > { %756 = vmatprep.subr.bf16.mxu0 %v2600_v26  ;;  %v2639_v8 = vld [vmem:[%s3112_s14 + $0x24] ss:$8 sps:$4 sm:$0xff]   ;;  %v2641_v9 = vld [vmem:[%s3112_s14 + $0x20] ss:$8 sps:$4 sm:$0xff]   ;;  %v2642_v10 = vld [vmem:[%s3112_s14 + $0x34] ss:$8 sps:$4 sm:$0xff]  }
  0x51   : > { %v2644_v11 = vld [vmem:[%s3112_s14 + $0x30] ss:$8 sps:$4 sm:$0xff]   ;;  %v2645_v12 = vld [vmem:[%s3112_s14 + $0x44] ss:$8 sps:$4 sm:$0xff]   ;;  %v2647_v13 = vld [vmem:[%s3112_s14 + $0x40] ss:$8 sps:$4 sm:$0xff]  }
  0x52   : > { %1246 = vmatpush1.bf16.msra.mxu1 %v2668_v49  ;;  %v2648_v14 = vld [vmem:[%s3112_s14 + $0x54] ss:$8 sps:$4 sm:$0xff]   ;;  %v2650_v15 = vld [vmem:[%s3112_s14 + $0x50] ss:$8 sps:$4 sm:$0xff]   ;;  %v2651_v16 = vld [vmem:[%s3112_s14 + $0x64] ss:$8 sps:$4 sm:$0xff]  }
  0x53   : > { %757 = vmatpush1.bf16.msra.mxu0 %v2602_v27  ;;  %1247 = vmatprep.subr.bf16.mxu1 %v2669_v50  ;;  %v2653_v17 = vld [vmem:[%s3112_s14 + $0x60] ss:$8 sps:$4 sm:$0xff]   ;;  %v2654_v18 = vld [vmem:[%s3112_s14 + $0x74] ss:$8 sps:$4 sm:$0xff]   ;;  %v2656_v19 = vld [vmem:[%s3112_s14 + $0x70] ss:$8 sps:$4 sm:$0xff]  }
  0x54   : > { %758 = vmatprep.subr.bf16.mxu0 %v2603_v28  ;;  %v2687_v20 = vld [vmem:[%s3783_s3 + $0xa4] ss:$8 sps:$4 sm:$0xff]   ;;  %v2689_v21 = vld [vmem:[%s3783_s3 + $0xa0] ss:$8 sps:$4 sm:$0xff]   ;;  %v2690_v22 = vld [vmem:[%s3783_s3 + $0xb4] ss:$8 sps:$4 sm:$0xff]  }
  0x55   : > { %v2692_v23 = vld [vmem:[%s3783_s3 + $0xb0] ss:$8 sps:$4 sm:$0xff]   ;;  %v2693_v24 = vld [vmem:[%s3783_s3 + $0xc4] ss:$8 sps:$4 sm:$0xff]   ;;  %v2695_v25 = vld [vmem:[%s3783_s3 + $0xc0] ss:$8 sps:$4 sm:$0xff]  }
  0x56   : > { %1248 = vmatpush1.bf16.msra.mxu1 %v2671_v52  ;;  %v2696_v26 = vld [vmem:[%s3783_s3 + $0xd4] ss:$8 sps:$4 sm:$0xff]   ;;  %v2698_v27 = vld [vmem:[%s3783_s3 + $0xd0] ss:$8 sps:$4 sm:$0xff]   ;;  %v2699_v28 = vld [vmem:[%s3783_s3 + $0xe4] ss:$8 sps:$4 sm:$0xff]  }
  0x57   : > { %759 = vmatpush1.bf16.msra.mxu0 %v2605_v30  ;;  %1249 = vmatprep.subr.bf16.mxu1 %v2672_v54  ;;  %v2701_v29 = vld [vmem:[%s3783_s3 + $0xe0] ss:$8 sps:$4 sm:$0xff]   ;;  %v2702_v30 = vld [vmem:[%s3783_s3 + $0xf4] ss:$8 sps:$4 sm:$0xff]  }
  0x58   : > { %760 = vmatprep.subr.bf16.mxu0 %v2606_v31  ;;  %v2704_v31 = vld [vmem:[%s3783_s3 + $0xf0] ss:$8 sps:$4 sm:$0xff]   ;;  %v494_v41 = vld [vmem:[%s3782_s2] sm:$0x3] }
  0x59   : > { %v3350_v36 = vld [vmem:[%s3785_s5 + $0x50] sm:$0xff]  }
  0x5a   : > { %1250 = vmatpush1.bf16.msra.mxu1 %v2674_v56  ;;  %v3356_v37 = vld [vmem:[%s3785_s5 + $0x10] sm:$0xff]  }
  0x5b   : > { %761 = vmatpush1.bf16.msra.mxu0 %v2608_v32  ;;  %1251 = vmatprep.subr.bf16.mxu1 %v2675_v58  ;;  %v2705_v32 = vld [vmem:[%s3785_s5 + $0x40] sm:$0xff]  }
  0x5c   : > { %762 = vmatprep.subr.bf16.mxu0 %v2609_v33  ;;  %v3333_v33 = vld [vmem:[%s3785_s5] sm:$0xff]  }
  0x5e   : > { %1252 = vmatpush1.bf16.msra.mxu1 %v2677_v60 }
  0x5f   : > { %763 = vmatpush1.bf16.msra.mxu0 %v2611_v34  ;;  %1253 = vmatprep.subr.bf16.mxu1 %v2678_v62  ;;  %v3338_v34 = vld [vmem:[%s3785_s5 + $0x48] sm:$0xff]  }
  0x60   : > { %764 = vmatprep.subr.bf16.mxu0 %v2612_v35  ;;  %v3344_v35 = vld [vmem:[%s3785_s5 + $0x8] sm:$0xff]  }
  0x62   : > { %1254 = vmatpush1.bf16.msra.mxu1 %v2680_v0 }
  0x63   : > { %765 = vmatpush1.bf16.msra.mxu0 %v2614_v38  ;;  %1255 = vmatprep.subr.bf16.mxu1 %v2681_v1  ;;  %v496_v38 = vlaneseq }
  0x64   : > { %766 = vmatprep.subr.bf16.mxu0 %v2615_v40 }
  0x65   : > { %v3360_v39 = vshrl.u32 %v496_v38, 7 }
  0x66   : > { %1256 = vmatpush1.bf16.msra.mxu1 %v2683_v4 }
  0x67   : > { %767 = vmatpush1.bf16.msra.mxu0 %v2617_v43  ;;  %1257 = vmatprep.subr.bf16.mxu1 %v2684_v5  ;;  %v498_v40 = vsub.s32 0, %v3360_v39  ;;  %v502_v42 = vsub.s32 1, %v3360_v39 }
  0x68   : > { %768 = vmatprep.subr.bf16.mxu0 %v2618_v44 }
  0x69   : > { %v3369_v43 = vrot.slane %v494_v41, %v498_v40  ;;  %v3373_v44 = vrot.slane %v494_v41, %v502_v42 }
  0x6a   : > { %1258 = vmatpush1.bf16.msra.mxu1 %v2686_v6 }
  0x6b   : > { %769 = vmatpush1.bf16.msra.mxu0 %v2620_v47  ;;  %1259 = vmatprep.subr.bf16.mxu1 %v2687_v20 }
  0x6c   : > { %770 = vmatprep.subr.bf16.mxu0 %v2621_v48 }
  0x6e   : > { %1260 = vmatpush1.bf16.msra.mxu1 %v2689_v21 }
  0x6f   : > { %771 = vmatpush1.bf16.msra.mxu0 %v2623_v51  ;;  %1261 = vmatprep.subr.bf16.mxu1 %v2690_v22 }
  0x70   : > { %772 = vmatprep.subr.bf16.mxu0 %v2624_v53 }
  0x72   : > { %1262 = vmatpush1.bf16.msra.mxu1 %v2692_v23 }
  0x73   : > { %773 = vmatpush1.bf16.msra.mxu0 %v2626_v55  ;;  %1263 = vmatprep.subr.bf16.mxu1 %v2693_v24 }
  0x74   : > { %774 = vmatprep.subr.bf16.mxu0 %v2627_v57 }
  0x76   : > { %1264 = vmatpush1.bf16.msra.mxu1 %v2695_v25 }
  0x77   : > { %775 = vmatpush1.bf16.msra.mxu0 %v2629_v59  ;;  %1265 = vmatprep.subr.bf16.mxu1 %v2696_v26 }
  0x78   : > { %776 = vmatprep.subr.bf16.mxu0 %v2630_v61 }
  0x7a   : > { %1266 = vmatpush1.bf16.msra.mxu1 %v2698_v27 }
  0x7b   : > { %777 = vmatpush1.bf16.msra.mxu0 %v2632_v63  ;;  %1267 = vmatprep.subr.bf16.mxu1 %v2699_v28 }
  0x7c   : > { %2368 = vmatprep.subr.bf16.mxu0 %v2705_v32 }
  0x7e   : > { %779 = vmatmul.mubr.bf16.vlgmr.msra.gmra.mrb[0].mxu0 %v2633_v2  ;;  %1268 = vmatpush1.bf16.msra.mxu1 %v2701_v29 }
  0x7f   : > { %788 = vmatprep.mubr.bf16.mxu0 %v2636_v3  ;;  %1269 = vmatprep.subr.bf16.mxu1 %v2702_v30 }
  0x80   : > { %2369 = vmatpush3.bf16.msra.mxu0 %v3333_v33 }
  0x81   : > { %2370 = vmatprep.subr.bf16.mxu0 %v3338_v34 }
  0x82   : > { %1270 = vmatpush1.bf16.msra.mxu1 %v2704_v31 }
  0x83   : > { %2480 = vmatprep.subr.bf16.mxu1 %v2705_v32 }
  0x84   : > { %2371 = vmatpush3.bf16.msra.mxu0 %v3344_v35 }
  0x85   : > { %2372 = vmatprep.subr.bf16.mxu0 %v3350_v36 }
  0x86   : > { %789 = vmatmul.mubr.bf16.gmra.mrb[4].mxu0 %v2638_v7 }
  0x87   : > { %798 = vmatprep.mubr.bf16.mxu0 %v2639_v8 }
  0x88   : > { %2373 = vmatpush3.bf16.msra.mxu0 %v3356_v37 }
  0x8e   : > { %799 = vmatmul.mubr.bf16.gmra.mrb[8].mxu0 %v2641_v9 }
  0x8f   : > { %808 = vmatprep.mubr.bf16.mxu0 %v2642_v10 }
  0x96   : > { %809 = vmatmul.mubr.bf16.gmra.mrb[12].mxu0 %v2644_v11 }
  0x97   : > { %818 = vmatprep.mubr.bf16.mxu0 %v2645_v12 }
  0x9e   : > { %819 = vmatmul.mubr.bf16.gmra.mrb[16].mxu0 %v2647_v13 }
  0x9f   : > { %828 = vmatprep.mubr.bf16.mxu0 %v2648_v14 }
  0xa6   : > { %829 = vmatmul.mubr.bf16.gmra.mrb[20].mxu0 %v2650_v15 }
  0xa7   : > { %838 = vmatprep.mubr.bf16.mxu0 %v2651_v16 }
  0xae   : > { %839 = vmatmul.mubr.bf16.gmra.mrb[24].mxu0 %v2653_v17 }
  0xaf   : > { %848 = vmatprep.mubr.bf16.mxu0 %v2654_v18 }
  0xb6   : > { %849 = vmatmul.mubr.bf16.gmra.mrb[28].mxu0 %v2656_v19 }
 0x151   : > { %v780_v45 = vpop.f32.mrb[0].mxu0 }
 0x152   : > { %v781_v46 = vadd.f32 %v780_v45, %v3369_v43  ;;  %v782_v47 = vpop.f32.mrb[1].mxu0 }
 0x153   : > { %v783_v48 = vadd.f32 %v782_v47, %v3373_v44  ;;  %v784_v49 = vpop.f32.mrb[2].mxu0 }
 0x154   : > { %v891_v50 = vmul.f32 0.70710677, %v781_v46  ;;  %v785_v51 = vadd.f32 %v784_v49, %v3369_v43  ;;  %v786_v52 = vpop.f32.mrb[3].mxu0  ;;  %v859_v9 = vmul.f32 0.5, %v781_v46 }
 0x155   : > { %v892_v53 = vmul.f32 0.70710677, %v783_v48  ;;  %v787_v54 = vadd.f32 %v786_v52, %v3373_v44  ;;  %v860_v19 = vmul.f32 0.5, %v783_v48 }
 0x156   : > { %2721 = verf.f32 %v891_v50  ;;  %v893_v55 = vmul.f32 0.70710677, %v785_v51  ;;  %v861_v14 = vmul.f32 0.5, %v785_v51 }
 0x157   : > { %2723 = verf.f32 %v892_v53  ;;  %v894_v56 = vmul.f32 0.70710677, %v787_v54  ;;  %v862_v25 = vmul.f32 0.5, %v787_v54 }
 0x158   : > { %2725 = verf.f32 %v893_v55 }
 0x159   : > { %2727 = verf.f32 %v894_v56  ;;  %v790_v57 = vpop.f32.mrb[4].mxu0 }
 0x15a   : > { %v791_v58 = vadd.f32 %v790_v57, %v3369_v43  ;;  %v792_v59 = vpop.f32.mrb[5].mxu0 }
 0x15b   : > { %v793_v60 = vadd.f32 %v792_v59, %v3373_v44  ;;  %v794_v61 = vpop.f32.mrb[6].mxu0 }
 0x15c   : > { %v895_v62 = vmul.f32 0.70710677, %v791_v58  ;;  %v795_v63 = vadd.f32 %v794_v61, %v3369_v43  ;;  %v796_v0 = vpop.f32.mrb[7].mxu0  ;;  %v863_v54 = vmul.f32 0.5, %v791_v58 }
 0x15d   : > { %v896_v1 = vmul.f32 0.70710677, %v793_v60  ;;  %v797_v2 = vadd.f32 %v796_v0, %v3373_v44  ;;  %v864_v61 = vmul.f32 0.5, %v793_v60 }
 0x15e   : > { %2729 = verf.f32 %v895_v62  ;;  %v897_v3 = vmul.f32 0.70710677, %v795_v63  ;;  %v865_v55 = vmul.f32 0.5, %v795_v63 }
 0x15f   : > { %2731 = verf.f32 %v896_v1  ;;  %v898_v4 = vmul.f32 0.70710677, %v797_v2  ;;  %v866_v62 = vmul.f32 0.5, %v797_v2 }
 0x160   : > { %v2722_v5 = vpop.eup %2721  ;;  %2733 = verf.f32 %v897_v3 }
 0x161   : > { %v2724_v6 = vpop.eup %2723  ;;  %2735 = verf.f32 %v898_v4  ;;  %v800_v7 = vpop.f32.mrb[8].mxu0  ;;  %v955_v10 = vadd.f32 1.0, %v2722_v5 }
 0x162   : > { %v2726_v8 = vpop.eup %2725  ;;  %v3384_v11 = vadd.f32 %v800_v7, %v3369_v43  ;;  %v802_v12 = vpop.f32.mrb[9].mxu0  ;;  %v956_v18 = vadd.f32 1.0, %v2724_v6 }
 0x163   : > { %v2728_v13 = vpop.eup %2727  ;;  %v957_v15 = vadd.f32 1.0, %v2726_v8  ;;  %v3387_v16 = vadd.f32 %v802_v12, %v3373_v44  ;;  %v804_v17 = vpop.f32.mrb[10].mxu0  ;;  %v987_v28 = vmul.f32 %v955_v10, %v859_v9 }
 0x164   : > { %v899_v20 = vmul.f32 0.70710677, %v3384_v11  ;;  %v3391_v21 = vadd.f32 %v804_v17, %v3369_v43  ;;  %v806_v22 = vpop.f32.mrb[11].mxu0  ;;  %v958_v23 = vadd.f32 1.0, %v2728_v13  ;;  %v988_v31 = vmul.f32 %v956_v18, %v860_v19 }
 0x165   : > { %v989_v24 = vmul.f32 %v957_v15, %v861_v14  ;;  %v900_v26 = vmul.f32 0.70710677, %v3387_v16  ;;  %v3395_v27 = vadd.f32 %v806_v22, %v3373_v44 }
 0x166   : > { %2737 = verf.f32 %v899_v20  ;;  %v901_v29 = vmul.f32 0.70710677, %v3391_v21  ;;  %v990_v32 = vmul.f32 %v958_v23, %v862_v25  ;;  %v867_v20 = vmul.f32 0.5, %v3384_v11 }
 0x167   : > { %2739 = verf.f32 %v900_v26  ;;  %v902_v30 = vmul.f32 0.70710677, %v3395_v27  ;;  %v1019_v41 = vpack.c.bf16 %v989_v24, %v987_v28  ;;  %v869_v22 = vmul.f32 0.5, %v3391_v21 }
 0x168   : > { %v2730_v38 = vpop.eup %2729  ;;  %2741 = verf.f32 %v901_v29  ;;  %v1020_v48 = vpack.c.bf16 %v990_v32, %v988_v31  ;;  %v868_v25 = vmul.f32 0.5, %v3387_v16  ;;  %v870_v26 = vmul.f32 0.5, %v3395_v27 }
 0x169   : > { %v2732_v45 = vpop.eup %2731  ;;  %v959_v46 = vadd.f32 1.0, %v2730_v38  ;;  %2743 = verf.f32 %v902_v30  ;;  %v810_v47 = vpop.f32.mrb[12].mxu0 }
 0x16a   : > { %v2734_v49 = vpop.eup %2733  ;;  %v960_v50 = vadd.f32 1.0, %v2732_v45  ;;  %v3400_v51 = vadd.f32 %v810_v47, %v3369_v43  ;;  %v812_v52 = vpop.f32.mrb[13].mxu0  ;;  %1271 = vmatprep.mubr.bf16.mxu1 %v1020_v48 }
 0x16b   : > { %v2736_v53 = vpop.eup %2735  ;;  %v961_v56 = vadd.f32 1.0, %v2734_v49  ;;  %v3403_v57 = vadd.f32 %v812_v52, %v3373_v44  ;;  %v814_v59 = vpop.f32.mrb[14].mxu0  ;;  %1272 = vmatmul.mubr.bf16.vlgmr.msra.gmra.mrb[0].mxu1 %v1019_v41  ;;  %v991_v4 = vmul.f32 %v959_v46, %v863_v54 }
 0x16c   : > { %v962_v0 = vadd.f32 1.0, %v2736_v53  ;;  %v903_v1 = vmul.f32 0.70710677, %v3400_v51  ;;  %v816_v3 = vpop.f32.mrb[15].mxu0  ;;  %v3408_v58 = vadd.f32 %v814_v59, %v3369_v43  ;;  %2488 = vmatpush3.bf16.msra.mxu1 %v3333_v33  ;;  %v992_v63 = vmul.f32 %v960_v50, %v864_v61 }
 0x16d   : > { %v993_v5 = vmul.f32 %v961_v56, %v865_v55  ;;  %v904_v6 = vmul.f32 0.70710677, %v3403_v57  ;;  %v3412_v60 = vadd.f32 %v816_v3, %v3373_v44  ;;  %2481 = vmatprep.subr.bf16.mxu1 %v3338_v34  ;;  %v871_v54 = vmul.f32 0.5, %v3400_v51 }
 0x16e   : > { %v994_v7 = vmul.f32 %v962_v0, %v866_v62  ;;  %2745 = verf.f32 %v903_v1  ;;  %v905_v2 = vmul.f32 0.70710677, %v3408_v58  ;;  %v872_v62 = vmul.f32 0.5, %v3403_v57 }
 0x16f   : > { %2747 = verf.f32 %v904_v6  ;;  %v1021_v8 = vpack.c.bf16 %v993_v5, %v991_v4  ;;  %v906_v10 = vmul.f32 0.70710677, %v3412_v60  ;;  %v873_v0 = vmul.f32 0.5, %v3408_v58 }
 0x170   : > { %v2738_v9 = vpop.eup %2737  ;;  %v1022_v12 = vpack.c.bf16 %v994_v7, %v992_v63  ;;  %2749 = verf.f32 %v905_v2  ;;  %2489 = vmatpush3.bf16.msra.mxu1 %v3344_v35  ;;  %v874_v5 = vmul.f32 0.5, %v3412_v60 }
 0x171   : > { %v2740_v13 = vpop.eup %2739  ;;  %v963_v14 = vadd.f32 1.0, %v2738_v9  ;;  %v820_v33 = vpop.f32.mrb[16].mxu0  ;;  %2751 = verf.f32 %v906_v10  ;;  %2482 = vmatprep.subr.bf16.mxu1 %v3350_v36 }
 0x172   : > { %v2742_v15 = vpop.eup %2741  ;;  %v964_v17 = vadd.f32 1.0, %v2740_v13  ;;  %v3419_v18 = vadd.f32 %v820_v33, %v3369_v43  ;;  %v822_v34 = vpop.f32.mrb[17].mxu0  ;;  %1281 = vmatprep.mubr.bf16.mxu1 %v1022_v12 }
 0x173   : > { %v2744_v19 = vpop.eup %2743  ;;  %v965_v23 = vadd.f32 1.0, %v2742_v15  ;;  %v3425_v24 = vadd.f32 %v822_v34, %v3373_v44  ;;  %v824_v35 = vpop.f32.mrb[18].mxu0  ;;  %1282 = vmatmul.mubr.bf16.gmra.mrb[4].mxu1 %v1021_v8  ;;  %v995_v36 = vmul.f32 %v963_v14, %v867_v20 }
 0x174   : > { %v966_v28 = vadd.f32 1.0, %v2744_v19  ;;  %v907_v29 = vmul.f32 0.70710677, %v3419_v18  ;;  %v826_v30 = vpop.f32.mrb[19].mxu0  ;;  %v825_v21 = vadd.f32 %v824_v35, %v3369_v43  ;;  %2490 = vmatpush3.bf16.msra.mxu1 %v3356_v37  ;;  %v996_v32 = vmul.f32 %v964_v17, %v868_v25 }
 0x175   : > { %v997_v31 = vmul.f32 %v965_v23, %v869_v22  ;;  %v908_v11 = vmul.f32 0.70710677, %v3425_v24  ;;  %v827_v16 = vadd.f32 %v826_v30, %v3373_v44  ;;  %v875_v20 = vmul.f32 0.5, %v3419_v18 }
 0x176   : > { %v998_v38 = vmul.f32 %v966_v28, %v870_v26  ;;  %2753 = verf.f32 %v907_v29  ;;  %v909_v27 = vmul.f32 0.70710677, %v825_v21  ;;  %v876_v26 = vmul.f32 0.5, %v3425_v24 }
 0x177   : > { %2755 = verf.f32 %v908_v11  ;;  %v1023_v41 = vpack.c.bf16 %v997_v31, %v995_v36  ;;  %v910_v46 = vmul.f32 0.70710677, %v827_v16  ;;  %v877_v28 = vmul.f32 0.5, %v825_v21 }
 0x178   : > { %v2746_v45 = vpop.eup %2745  ;;  %v1024_v47 = vpack.c.bf16 %v998_v38, %v996_v32  ;;  %2757 = verf.f32 %v909_v27  ;;  %v878_v31 = vmul.f32 0.5, %v827_v16 }
 0x179   : > { %v2748_v48 = vpop.eup %2747  ;;  %v830_v49 = vpop.f32.mrb[20].mxu0  ;;  %v967_v50 = vadd.f32 1.0, %v2746_v45  ;;  %2759 = verf.f32 %v910_v46 }
 0x17a   : > { %v3435_v52 = vadd.f32 %v830_v49, %v3369_v43  ;;  %v832_v37 = vpop.f32.mrb[21].mxu0  ;;  %1291 = vmatprep.mubr.bf16.mxu1 %v1024_v47  ;;  %v2750_v53 = vpop.eup %2749  ;;  %v968_v55 = vadd.f32 1.0, %v2748_v48 }
 0x17b   : > { %v3439_v56 = vadd.f32 %v832_v37, %v3373_v44  ;;  %v834_v59 = vpop.f32.mrb[22].mxu0  ;;  %v2752_v61 = vpop.eup %2751  ;;  %v969_v1 = vadd.f32 1.0, %v2750_v53  ;;  %1292 = vmatmul.mubr.bf16.gmra.mrb[8].mxu1 %v1023_v41  ;;  %v999_v7 = vmul.f32 %v967_v50, %v871_v54 }
 0x17c   : > { %v911_v3 = vmul.f32 0.70710677, %v3435_v52  ;;  %v836_v4 = vpop.f32.mrb[23].mxu0  ;;  %v970_v6 = vadd.f32 1.0, %v2752_v61  ;;  %v3447_v63 = vadd.f32 %v834_v59, %v3369_v43  ;;  %v1000_v58 = vmul.f32 %v968_v55, %v872_v62 }
 0x17d   : > { %v912_v51 = vmul.f32 0.70710677, %v3439_v56  ;;  %v1001_v2 = vmul.f32 %v969_v1, %v873_v0  ;;  %v3450_v57 = vadd.f32 %v836_v4, %v3373_v44  ;;  %v879_v59 = vmul.f32 0.5, %v3435_v52 }
 0x17e   : > { %2761 = verf.f32 %v911_v3  ;;  %v1002_v8 = vmul.f32 %v970_v6, %v874_v5  ;;  %v913_v9 = vmul.f32 0.70710677, %v3447_v63  ;;  %v880_v3 = vmul.f32 0.5, %v3439_v56 }
 0x17f   : > { %2763 = verf.f32 %v912_v51  ;;  %v914_v60 = vmul.f32 0.70710677, %v3450_v57  ;;  %v1025_v12 = vpack.c.bf16 %v1001_v2, %v999_v7  ;;  %v881_v4 = vmul.f32 0.5, %v3447_v63 }
 0x180   : > { %v2754_v10 = vpop.eup %2753  ;;  %2765 = verf.f32 %v913_v9  ;;  %v1026_v33 = vpack.c.bf16 %v1002_v8, %v1000_v58  ;;  %v882_v7 = vmul.f32 0.5, %v3450_v57 }
 0x181   : > { %v2756_v13 = vpop.eup %2755  ;;  %v840_v14 = vpop.f32.mrb[24].mxu0  ;;  %v971_v15 = vadd.f32 1.0, %v2754_v10  ;;  %2767 = verf.f32 %v914_v60 }
 0x182   : > { %v3455_v17 = vadd.f32 %v840_v14, %v3369_v43  ;;  %v842_v34 = vpop.f32.mrb[25].mxu0  ;;  %v2758_v19 = vpop.eup %2757  ;;  %v972_v22 = vadd.f32 1.0, %v2756_v13  ;;  %1301 = vmatprep.mubr.bf16.mxu1 %v1026_v33 }
 0x183   : > { %v3459_v23 = vadd.f32 %v842_v34, %v3373_v44  ;;  %v844_v35 = vpop.f32.mrb[26].mxu0  ;;  %v2760_v25 = vpop.eup %2759  ;;  %v973_v29 = vadd.f32 1.0, %v2758_v19  ;;  %1302 = vmatmul.mubr.bf16.gmra.mrb[12].mxu1 %v1025_v12  ;;  %v1003_v38 = vmul.f32 %v971_v15, %v875_v20 }
 0x184   : > { %v915_v30 = vmul.f32 0.70710677, %v3455_v17  ;;  %v846_v36 = vpop.f32.mrb[27].mxu0  ;;  %v974_v11 = vadd.f32 1.0, %v2760_v25  ;;  %v845_v18 = vadd.f32 %v844_v35, %v3369_v43  ;;  %v1004_v45 = vmul.f32 %v972_v22, %v876_v26 }
 0x185   : > { %v916_v32 = vmul.f32 0.70710677, %v3459_v23  ;;  %v1005_v27 = vmul.f32 %v973_v29, %v877_v28  ;;  %v847_v41 = vadd.f32 %v846_v36, %v3373_v44  ;;  %v883_v20 = vmul.f32 0.5, %v3455_v17 }
 0x186   : > { %2769 = verf.f32 %v915_v30  ;;  %v1006_v46 = vmul.f32 %v974_v11, %v878_v31  ;;  %v917_v24 = vmul.f32 0.70710677, %v845_v18  ;;  %v885_v22 = vmul.f32 0.5, %v845_v18 }
 0x187   : > { %2771 = verf.f32 %v916_v32  ;;  %v918_v47 = vmul.f32 0.70710677, %v847_v41  ;;  %v1027_v48 = vpack.c.bf16 %v1005_v27, %v1003_v38  ;;  %v884_v35 = vmul.f32 0.5, %v3459_v23 }
 0x188   : > { %v2762_v21 = vpop.eup %2761  ;;  %2773 = verf.f32 %v917_v24  ;;  %v1028_v50 = vpack.c.bf16 %v1006_v46, %v1004_v45  ;;  %v886_v25 = vmul.f32 0.5, %v847_v41 }
 0x189   : > { %v2764_v49 = vpop.eup %2763  ;;  %v850_v16 = vpop.f32.mrb[28].mxu0  ;;  %v975_v37 = vadd.f32 1.0, %v2762_v21  ;;  %2775 = verf.f32 %v918_v47 }
 0x18a   : > { %v851_v53 = vadd.f32 %v850_v16, %v3369_v43  ;;  %v852_v54 = vpop.f32.mrb[29].mxu0  ;;  %v2766_v55 = vpop.eup %2765  ;;  %v976_v61 = vadd.f32 1.0, %v2764_v49  ;;  %1311 = vmatprep.mubr.bf16.mxu1 %v1028_v50 }
 0x18b   : > { %v853_v62 = vadd.f32 %v852_v54, %v3373_v44  ;;  %v854_v0 = vpop.f32.mrb[30].mxu0  ;;  %v2768_v1 = vpop.eup %2767  ;;  %v977_v5 = vadd.f32 1.0, %v2766_v55  ;;  %1312 = vmatmul.mubr.bf16.gmra.mrb[16].mxu1 %v1027_v48  ;;  %v1007_v8 = vmul.f32 %v975_v37, %v879_v59  ;;  %v2711_v55 = vld [vmem:[%s3785_s5 + $0x58] sm:$0xff]   ;;  %v2713_v59 = vld [vmem:[%s3785_s5 + $0x60] sm:$0xff]  }
 0x18c   : > { %v919_v6 = vmul.f32 0.70710677, %v851_v53  ;;  %v856_v51 = vpop.f32.mrb[31].mxu0  ;;  %v978_v2 = vadd.f32 1.0, %v2768_v1  ;;  %v855_v52 = vadd.f32 %v854_v0, %v3369_v43  ;;  %v1008_v60 = vmul.f32 %v976_v61, %v880_v3  ;;  %2374 = vmatprep.subr.bf16.mxu0 %v2711_v55  ;;  %2483 = vmatprep.subr.bf16.mxu1 %v2711_v55  ;;  %v2714_v61 = vld [vmem:[%s3785_s5 + $0x20] sm:$0xff]   ;;  %v2716_v0 = vld [vmem:[%s3785_s5 + $0x28] sm:$0xff]  }
 0x18d   : > { %v920_v58 = vmul.f32 0.70710677, %v853_v62  ;;  %v1009_v9 = vmul.f32 %v977_v5, %v881_v4  ;;  %v857_v10 = vadd.f32 %v856_v51, %v3373_v44  ;;  %v887_v18 = vmul.f32 0.5, %v851_v53  ;;  %v2712_v53 = vld [vmem:[%s3785_s5 + $0x18] sm:$0xff]   ;;  %v2717_v1 = vld [vmem:[%s3785_s5 + $0x70] sm:$0xff]  }
 0x18e   : > { %2777 = verf.f32 %v919_v6  ;;  %v1010_v12 = vmul.f32 %v978_v2, %v882_v7  ;;  %v921_v56 = vmul.f32 0.70710677, %v855_v52  ;;  %v889_v24 = vmul.f32 0.5, %v855_v52  ;;  %2375 = vmatpush3.bf16.msra.mxu0 %v2712_v53  ;;  %2491 = vmatpush3.bf16.msra.mxu1 %v2712_v53  ;;  %v2718_v3 = vld [vmem:[%s3785_s5 + $0x30] sm:$0xff]   ;;  %v2719_v4 = vld [vmem:[%s3785_s5 + $0x78] sm:$0xff]  }
 0x18f   : > { %2779 = verf.f32 %v920_v58  ;;  %v922_v13 = vmul.f32 0.70710677, %v857_v10  ;;  %v1029_v14 = vpack.c.bf16 %v1009_v9, %v1007_v8  ;;  %v888_v23 = vmul.f32 0.5, %v853_v62  ;;  %2376 = vmatprep.subr.bf16.mxu0 %v2713_v59  ;;  %2484 = vmatprep.subr.bf16.mxu1 %v2713_v59  ;;  %v2715_v62 = vld [vmem:[%s3785_s5 + $0x68] sm:$0xff]   ;;  %v2720_v5 = vld [vmem:[%s3785_s5 + $0x38] sm:$0xff]  }
 0x190   : > { %v2770_v63 = vpop.eup %2769  ;;  %2781 = verf.f32 %v921_v56  ;;  %v1030_v15 = vpack.c.bf16 %v1010_v12, %v1008_v60  ;;  %v890_v41 = vmul.f32 0.5, %v857_v10  ;;  %v1067_v6 = vld [vmem:[%s3784_s4] sm:$0x3] }
 0x191   : > { %v2772_v33 = vpop.eup %2771  ;;  %v979_v57 = vadd.f32 1.0, %v2770_v63  ;;  %2783 = verf.f32 %v922_v13  ;;  %v3511_v51 = vrot.slane %v1067_v6, %v498_v40  ;;  %v3515_v7 = vrot.slane %v1067_v6, %v502_v42 }
 0x192   : > { %v2774_v34 = vpop.eup %2773  ;;  %v980_v19 = vadd.f32 1.0, %v2772_v33  ;;  %1321 = vmatprep.mubr.bf16.mxu1 %v1030_v15  ;;  %2377 = vmatpush3.bf16.msra.mxu0 %v2714_v61 }
 0x193   : > { %v2776_v43 = vpop.eup %2775  ;;  %v981_v44 = vadd.f32 1.0, %v2774_v34  ;;  %1322 = vmatmul.mubr.bf16.gmra.mrb[20].mxu1 %v1029_v14  ;;  %v1011_v28 = vmul.f32 %v979_v57, %v883_v20  ;;  %2378 = vmatprep.subr.bf16.mxu0 %v2715_v62 }
 0x194   : > { %v982_v26 = vadd.f32 1.0, %v2776_v43  ;;  %v1012_v30 = vmul.f32 %v980_v19, %v884_v35  ;;  %2492 = vmatpush3.bf16.msra.mxu1 %v2714_v61 }
 0x195   : > { %v1013_v29 = vmul.f32 %v981_v44, %v885_v22  ;;  %2485 = vmatprep.subr.bf16.mxu1 %v2715_v62 }
 0x196   : > { %v1014_v36 = vmul.f32 %v982_v26, %v886_v25  ;;  %2379 = vmatpush3.bf16.msra.mxu0 %v2716_v0 }
 0x197   : > { %v1031_v11 = vpack.c.bf16 %v1013_v29, %v1011_v28  ;;  %2380 = vmatprep.subr.bf16.mxu0 %v2717_v1 }
 0x198   : > { %v2778_v31 = vpop.eup %2777  ;;  %v1032_v38 = vpack.c.bf16 %v1014_v36, %v1012_v30  ;;  %2493 = vmatpush3.bf16.msra.mxu1 %v2716_v0 }
 0x199   : > { %v2780_v32 = vpop.eup %2779  ;;  %v983_v27 = vadd.f32 1.0, %v2778_v31  ;;  %2486 = vmatprep.subr.bf16.mxu1 %v2717_v1 }
 0x19a   : > { %v2782_v45 = vpop.eup %2781  ;;  %v984_v46 = vadd.f32 1.0, %v2780_v32  ;;  %1331 = vmatprep.mubr.bf16.mxu1 %v1032_v38  ;;  %2381 = vmatpush3.bf16.msra.mxu0 %v2718_v3 }
 0x19b   : > { %v2784_v17 = vpop.eup %2783  ;;  %v985_v21 = vadd.f32 1.0, %v2782_v45  ;;  %1332 = vmatmul.mubr.bf16.gmra.mrb[24].mxu1 %v1031_v11  ;;  %v1015_v48 = vmul.f32 %v983_v27, %v887_v18  ;;  %2382 = vmatprep.subr.bf16.mxu0 %v2719_v4 }
 0x19c   : > { %v986_v47 = vadd.f32 1.0, %v2784_v17  ;;  %v1016_v16 = vmul.f32 %v984_v46, %v888_v23  ;;  %2494 = vmatpush3.bf16.msra.mxu1 %v2718_v3 }
 0x19d   : > { %v1017_v49 = vmul.f32 %v985_v21, %v889_v24  ;;  %2487 = vmatprep.subr.bf16.mxu1 %v2719_v4 }
 0x19e   : > { %v1018_v50 = vmul.f32 %v986_v47, %v890_v41  ;;  %2383 = vmatpush3.bf16.msra.mxu0 %v2720_v5 }
 0x19f   : > { %v1033_v37 = vpack.c.bf16 %v1017_v49, %v1015_v48 }
 0x1a0   : > { %v1034_v54 = vpack.c.bf16 %v1018_v50, %v1016_v16  ;;  %2495 = vmatpush3.bf16.msra.mxu1 %v2720_v5 }
 0x1a2   : > { %1341 = vmatprep.mubr.bf16.mxu1 %v1034_v54 }
 0x1a3   : > { %1342 = vmatmul.mubr.bf16.gmra.mrb[28].mxu1 %v1033_v37 }
 0x23e   : > { %v1273_v2 = vpop.f32.mrb[0].mxu1 }
 0x23f   : > { %v1274_v58 = vadd.f32 %v1273_v2, %v3511_v51  ;;  %v1275_v52 = vpop.f32.mrb[1].mxu1 }
 0x240   : > { %v1276_v8 = vadd.f32 %v1275_v52, %v3515_v7  ;;  %v1277_v9 = vpop.f32.mrb[2].mxu1 }
 0x241   : > { %v1384_v10 = vmul.f32 0.70710677, %v1274_v58  ;;  %v1278_v60 = vadd.f32 %v1277_v9, %v3511_v51  ;;  %v1279_v12 = vpop.f32.mrb[3].mxu1  ;;  %v1352_v32 = vmul.f32 0.5, %v1274_v58 }
 0x242   : > { %v1385_v56 = vmul.f32 0.70710677, %v1276_v8  ;;  %v1280_v63 = vadd.f32 %v1279_v12, %v3515_v7  ;;  %v1353_v17 = vmul.f32 0.5, %v1276_v8 }
 0x243   : > { %2785 = verf.f32 %v1384_v10  ;;  %v1386_v40 = vmul.f32 0.70710677, %v1278_v60  ;;  %v1354_v38 = vmul.f32 0.5, %v1278_v60 }
 0x244   : > { %2787 = verf.f32 %v1385_v56  ;;  %v1387_v39 = vmul.f32 0.70710677, %v1280_v63  ;;  %v1355_v18 = vmul.f32 0.5, %v1280_v63 }
 0x245   : > { %2789 = verf.f32 %v1386_v40 }
 0x246   : > { %2791 = verf.f32 %v1387_v39  ;;  %v1283_v42 = vpop.f32.mrb[4].mxu1 }
 0x247   : > { %v1284_v13 = vadd.f32 %v1283_v42, %v3511_v51  ;;  %v1285_v14 = vpop.f32.mrb[5].mxu1 }
 0x248   : > { %v1286_v33 = vadd.f32 %v1285_v14, %v3515_v7  ;;  %v1287_v15 = vpop.f32.mrb[6].mxu1 }
 0x249   : > { %v1388_v57 = vmul.f32 0.70710677, %v1284_v13  ;;  %v1288_v34 = vadd.f32 %v1287_v15, %v3511_v51  ;;  %v1289_v19 = vpop.f32.mrb[7].mxu1  ;;  %v1356_v58 = vmul.f32 0.5, %v1284_v13 }
 0x24a   : > { %v1389_v43 = vmul.f32 0.70710677, %v1286_v33  ;;  %v1290_v20 = vadd.f32 %v1289_v19, %v3515_v7  ;;  %v1357_v60 = vmul.f32 0.5, %v1286_v33 }
 0x24b   : > { %2793 = verf.f32 %v1388_v57  ;;  %v1390_v22 = vmul.f32 0.70710677, %v1288_v34  ;;  %v1358_v52 = vmul.f32 0.5, %v1288_v34 }
 0x24c   : > { %2795 = verf.f32 %v1389_v43  ;;  %v1391_v44 = vmul.f32 0.70710677, %v1290_v20  ;;  %v1359_v12 = vmul.f32 0.5, %v1290_v20 }
 0x24d   : > { %v2786_v35 = vpop.eup %2785  ;;  %2797 = verf.f32 %v1390_v22 }
 0x24e   : > { %v2788_v25 = vpop.eup %2787  ;;  %v1448_v26 = vadd.f32 1.0, %v2786_v35  ;;  %2799 = verf.f32 %v1391_v44  ;;  %v1293_v28 = vpop.f32.mrb[8].mxu1 }
 0x24f   : > { %v2790_v29 = vpop.eup %2789  ;;  %v1449_v30 = vadd.f32 1.0, %v2788_v25  ;;  %v3526_v36 = vadd.f32 %v1293_v28, %v3511_v51  ;;  %v1295_v31 = vpop.f32.mrb[9].mxu1 }
 0x250   : > { %v2792_v11 = vpop.eup %2791  ;;  %v1450_v27 = vadd.f32 1.0, %v2790_v29  ;;  %v3529_v45 = vadd.f32 %v1295_v31, %v3515_v7  ;;  %v1297_v46 = vpop.f32.mrb[10].mxu1  ;;  %v1480_v41 = vmul.f32 %v1448_v26, %v1352_v32 }
 0x251   : > { %v1451_v24 = vadd.f32 1.0, %v2792_v11  ;;  %v1392_v21 = vmul.f32 0.70710677, %v3526_v36  ;;  %v1299_v23 = vpop.f32.mrb[11].mxu1  ;;  %v1298_v49 = vadd.f32 %v1297_v46, %v3511_v51  ;;  %v1481_v16 = vmul.f32 %v1449_v30, %v1353_v17 }
 0x252   : > { %v1482_v47 = vmul.f32 %v1450_v27, %v1354_v38  ;;  %v1393_v48 = vmul.f32 0.70710677, %v3529_v45  ;;  %v1300_v37 = vadd.f32 %v1299_v23, %v3515_v7  ;;  %v1360_v30 = vmul.f32 0.5, %v3526_v36 }
 0x253   : > { %v1483_v50 = vmul.f32 %v1451_v24, %v1355_v18  ;;  %2801 = verf.f32 %v1392_v21  ;;  %v1394_v55 = vmul.f32 0.70710677, %v1298_v49  ;;  %v1361_v27 = vmul.f32 0.5, %v3529_v45 }
 0x254   : > { %v1512_v54 = vpack.c.bf16 %v1482_v47, %v1480_v41  ;;  %2803 = verf.f32 %v1393_v48  ;;  %v1395_v59 = vmul.f32 0.70710677, %v1300_v37  ;;  %v1362_v46 = vmul.f32 0.5, %v1298_v49 }
 0x255   : > { %v2794_v53 = vpop.eup %2793  ;;  %v1513_v61 = vpack.c.bf16 %v1483_v50, %v1481_v16  ;;  %2805 = verf.f32 %v1394_v55  ;;  %v1363_v21 = vmul.f32 0.5, %v1300_v37 }
 0x256   : > { %v2796_v62 = vpop.eup %2795  ;;  %v1452_v0 = vadd.f32 1.0, %v2794_v53  ;;  %v1303_v1 = vpop.f32.mrb[12].mxu1  ;;  %2807 = verf.f32 %v1395_v59 }
 0x257   : > { %v2798_v3 = vpop.eup %2797  ;;  %v1453_v4 = vadd.f32 1.0, %v2796_v62  ;;  %v3536_v5 = vadd.f32 %v1303_v1, %v3511_v51  ;;  %v1305_v6 = vpop.f32.mrb[13].mxu1  ;;  %1695 = vmatprep.mubr.bf16.mxu0 %v1513_v61 }
 0x258   : > { %v2800_v2 = vpop.eup %2799  ;;  %v1454_v8 = vadd.f32 1.0, %v2798_v3  ;;  %v3539_v9 = vadd.f32 %v1305_v6, %v3515_v7  ;;  %v1307_v10 = vpop.f32.mrb[14].mxu1  ;;  %1696 = vmatmul.mubr.bf16.vlgmr.msra.gmra.mrb[32].mxu0 %v1512_v54  ;;  %v1484_v39 = vmul.f32 %v1452_v0, %v1356_v58 }
 0x259   : > { %v1455_v56 = vadd.f32 1.0, %v2800_v2  ;;  %v1396_v63 = vmul.f32 0.70710677, %v3536_v5  ;;  %v1309_v40 = vpop.f32.mrb[15].mxu1  ;;  %v1308_v15 = vadd.f32 %v1307_v10, %v3511_v51  ;;  %v1485_v13 = vmul.f32 %v1453_v4, %v1357_v60 }
 0x25a   : > { %v1486_v42 = vmul.f32 %v1454_v8, %v1358_v52  ;;  %v1397_v14 = vmul.f32 0.70710677, %v3539_v9  ;;  %v1310_v34 = vadd.f32 %v1309_v40, %v3515_v7  ;;  %v1364_v4 = vmul.f32 0.5, %v3536_v5 }
 0x25b   : > { %v1487_v57 = vmul.f32 %v1455_v56, %v1359_v12  ;;  %2809 = verf.f32 %v1396_v63  ;;  %v1398_v19 = vmul.f32 0.70710677, %v1308_v15  ;;  %v1365_v8 = vmul.f32 0.5, %v3539_v9 }
 0x25c   : > { %2811 = verf.f32 %v1397_v14  ;;  %v1514_v43 = vpack.c.bf16 %v1486_v42, %v1484_v39  ;;  %v1399_v20 = vmul.f32 0.70710677, %v1310_v34  ;;  %v1366_v10 = vmul.f32 0.5, %v1308_v15 }
 0x25d   : > { %v2802_v33 = vpop.eup %2801  ;;  %v1515_v22 = vpack.c.bf16 %v1487_v57, %v1485_v13  ;;  %2813 = verf.f32 %v1398_v19  ;;  %v1367_v63 = vmul.f32 0.5, %v1310_v34 }
 0x25e   : > { %v2804_v44 = vpop.eup %2803  ;;  %v1313_v35 = vpop.f32.mrb[16].mxu1  ;;  %v1456_v25 = vadd.f32 1.0, %v2802_v33  ;;  %2815 = verf.f32 %v1399_v20 }
 0x25f   : > { %v3546_v26 = vadd.f32 %v1313_v35, %v3511_v51  ;;  %v1315_v28 = vpop.f32.mrb[17].mxu1  ;;  %1703 = vmatprep.mubr.bf16.mxu0 %v1515_v22  ;;  %v2806_v29 = vpop.eup %2805  ;;  %v1457_v31 = vadd.f32 1.0, %v2804_v44 }
 0x260   : > { %v3550_v11 = vadd.f32 %v1315_v28, %v3515_v7  ;;  %v1317_v32 = vpop.f32.mrb[18].mxu1  ;;  %1704 = vmatmul.mubr.bf16.gmra.mrb[36].mxu0 %v1514_v43  ;;  %v2808_v38 = vpop.eup %2807  ;;  %v1458_v17 = vadd.f32 1.0, %v2806_v29  ;;  %v1488_v47 = vmul.f32 %v1456_v25, %v1360_v30 }
 0x261   : > { %v1400_v18 = vmul.f32 0.70710677, %v3546_v26  ;;  %v1319_v24 = vpop.f32.mrb[19].mxu1  ;;  %v1459_v23 = vadd.f32 1.0, %v2808_v38  ;;  %v3556_v36 = vadd.f32 %v1317_v32, %v3511_v51  ;;  %v1489_v50 = vmul.f32 %v1457_v31, %v1361_v27 }
 0x262   : > { %v1401_v41 = vmul.f32 0.70710677, %v3550_v11  ;;  %v1490_v48 = vmul.f32 %v1458_v17, %v1362_v46  ;;  %v3559_v16 = vadd.f32 %v1319_v24, %v3515_v7  ;;  %v1368_v29 = vmul.f32 0.5, %v3546_v26 }
 0x263   : > { %2817 = verf.f32 %v1400_v18  ;;  %v1491_v45 = vmul.f32 %v1459_v23, %v1363_v21  ;;  %v1402_v49 = vmul.f32 0.70710677, %v3556_v36  ;;  %v1369_v27 = vmul.f32 0.5, %v3550_v11 }
 0x264   : > { %2819 = verf.f32 %v1401_v41  ;;  %v1403_v37 = vmul.f32 0.70710677, %v3559_v16  ;;  %v1516_v55 = vpack.c.bf16 %v1490_v48, %v1488_v47  ;;  %v1370_v46 = vmul.f32 0.5, %v3556_v36 }
 0x265   : > { %v2810_v54 = vpop.eup %2809  ;;  %2821 = verf.f32 %v1402_v49  ;;  %v1517_v61 = vpack.c.bf16 %v1491_v45, %v1489_v50  ;;  %v1371_v21 = vmul.f32 0.5, %v3559_v16 }
 0x266   : > { %v2812_v53 = vpop.eup %2811  ;;  %v1323_v59 = vpop.f32.mrb[20].mxu1  ;;  %v1460_v62 = vadd.f32 1.0, %v2810_v54  ;;  %2823 = verf.f32 %v1403_v37 }
 0x267   : > { %v3564_v0 = vadd.f32 %v1323_v59, %v3511_v51  ;;  %v1325_v1 = vpop.f32.mrb[21].mxu1  ;;  %v2814_v3 = vpop.eup %2813  ;;  %v1461_v6 = vadd.f32 1.0, %v2812_v53  ;;  %1711 = vmatprep.mubr.bf16.mxu0 %v1517_v61 }
 0x268   : > { %v3568_v2 = vadd.f32 %v1325_v1, %v3515_v7  ;;  %v1327_v58 = vpop.f32.mrb[22].mxu1  ;;  %v2816_v52 = vpop.eup %2815  ;;  %v1462_v60 = vadd.f32 1.0, %v2814_v3  ;;  %1712 = vmatmul.mubr.bf16.gmra.mrb[40].mxu0 %v1516_v55  ;;  %v1492_v42 = vmul.f32 %v1460_v62, %v1364_v4 }
 0x269   : > { %v1404_v12 = vmul.f32 0.70710677, %v3564_v0  ;;  %v1329_v56 = vpop.f32.mrb[23].mxu1  ;;  %v1463_v40 = vadd.f32 1.0, %v2816_v52  ;;  %v3574_v5 = vadd.f32 %v1327_v58, %v3511_v51  ;;  %v1493_v9 = vmul.f32 %v1461_v6, %v1365_v8 }
 0x26a   : > { %v1405_v39 = vmul.f32 0.70710677, %v3568_v2  ;;  %v1494_v14 = vmul.f32 %v1462_v60, %v1366_v10  ;;  %v3577_v13 = vadd.f32 %v1329_v56, %v3515_v7  ;;  %v1372_v3 = vmul.f32 0.5, %v3564_v0 }
 0x26b   : > { %2825 = verf.f32 %v1404_v12  ;;  %v1495_v15 = vmul.f32 %v1463_v40, %v1367_v63  ;;  %v1406_v57 = vmul.f32 0.70710677, %v3574_v5  ;;  %v1373_v8 = vmul.f32 0.5, %v3568_v2 }
 0x26c   : > { %2827 = verf.f32 %v1405_v39  ;;  %v1407_v34 = vmul.f32 0.70710677, %v3577_v13  ;;  %v1518_v43 = vpack.c.bf16 %v1494_v14, %v1492_v42  ;;  %v1374_v10 = vmul.f32 0.5, %v3574_v5 }
 0x26d   : > { %v2818_v19 = vpop.eup %2817  ;;  %2829 = verf.f32 %v1406_v57  ;;  %v1519_v22 = vpack.c.bf16 %v1495_v15, %v1493_v9  ;;  %v1375_v63 = vmul.f32 0.5, %v3577_v13 }
 0x26e   : > { %v2820_v33 = vpop.eup %2819  ;;  %v1333_v20 = vpop.f32.mrb[24].mxu1  ;;  %v1464_v44 = vadd.f32 1.0, %v2818_v19  ;;  %2831 = verf.f32 %v1407_v34 }
 0x26f   : > { %v3582_v35 = vadd.f32 %v1333_v20, %v3511_v51  ;;  %v1335_v25 = vpop.f32.mrb[25].mxu1  ;;  %v2822_v28 = vpop.eup %2821  ;;  %v1465_v30 = vadd.f32 1.0, %v2820_v33  ;;  %1719 = vmatprep.mubr.bf16.mxu0 %v1519_v22 }
 0x270   : > { %v3586_v31 = vadd.f32 %v1335_v25, %v3515_v7  ;;  %v1337_v32 = vpop.f32.mrb[26].mxu1  ;;  %v2824_v38 = vpop.eup %2823  ;;  %v1466_v17 = vadd.f32 1.0, %v2822_v28  ;;  %1720 = vmatmul.mubr.bf16.gmra.mrb[44].mxu0 %v1518_v43  ;;  %v1496_v47 = vmul.f32 %v1464_v44, %v1368_v29 }
 0x271   : > { %v1408_v18 = vmul.f32 0.70710677, %v3582_v35  ;;  %v1339_v24 = vpop.f32.mrb[27].mxu1  ;;  %v1467_v23 = vadd.f32 1.0, %v2824_v38  ;;  %v1338_v41 = vadd.f32 %v1337_v32, %v3511_v51  ;;  %v1497_v11 = vmul.f32 %v1465_v30, %v1369_v27 }
 0x272   : > { %v1409_v26 = vmul.f32 0.70710677, %v3586_v31  ;;  %v1498_v48 = vmul.f32 %v1466_v17, %v1370_v46  ;;  %v1340_v50 = vadd.f32 %v1339_v24, %v3515_v7  ;;  %v1376_v44 = vmul.f32 0.5, %v3582_v35 }
 0x273   : > { %2833 = verf.f32 %v1408_v18  ;;  %v1499_v45 = vmul.f32 %v1467_v23, %v1371_v21  ;;  %v1410_v36 = vmul.f32 0.70710677, %v1338_v41  ;;  %v1378_v25 = vmul.f32 0.5, %v1338_v41 }
 0x274   : > { %2835 = verf.f32 %v1409_v26  ;;  %v1520_v54 = vpack.c.bf16 %v1498_v48, %v1496_v47  ;;  %v1411_v37 = vmul.f32 0.70710677, %v1340_v50  ;;  %v1377_v28 = vmul.f32 0.5, %v3586_v31 }
 0x275   : > { %v2826_v49 = vpop.eup %2825  ;;  %2837 = verf.f32 %v1410_v36  ;;  %v1521_v53 = vpack.c.bf16 %v1499_v45, %v1497_v11  ;;  %v1379_v29 = vmul.f32 0.5, %v1340_v50 }
 0x276   : > { %v2828_v55 = vpop.eup %2827  ;;  %v1343_v16 = vpop.f32.mrb[28].mxu1  ;;  %v1468_v59 = vadd.f32 1.0, %v2826_v49  ;;  %2839 = verf.f32 %v1411_v37 }
 0x277   : > { %v1344_v61 = vadd.f32 %v1343_v16, %v3511_v51  ;;  %v1345_v62 = vpop.f32.mrb[29].mxu1  ;;  %v2830_v1 = vpop.eup %2829  ;;  %v1469_v4 = vadd.f32 1.0, %v2828_v55  ;;  %1727 = vmatprep.mubr.bf16.mxu1 %v1521_v53 }
 0x278   : > { %v1346_v6 = vadd.f32 %v1345_v62, %v3515_v7  ;;  %v1347_v58 = vpop.f32.mrb[30].mxu1  ;;  %v2832_v52 = vpop.eup %2831  ;;  %v1470_v60 = vadd.f32 1.0, %v2830_v1  ;;  %1728 = vmatmul.mubr.bf16.vlgmr.msra.gmra.mrb[32].mxu1 %v1520_v54  ;;  %v1500_v42 = vmul.f32 %v1468_v59, %v1372_v3 }
 0x279   : > { %v1412_v12 = vmul.f32 0.70710677, %v1344_v61  ;;  %v1349_v56 = vpop.f32.mrb[31].mxu1  ;;  %v1471_v40 = vadd.f32 1.0, %v2832_v52  ;;  %v1348_v0 = vadd.f32 %v1347_v58, %v3511_v51  ;;  %v1501_v15 = vmul.f32 %v1469_v4, %v1373_v8 }
 0x27a   : > { %v1413_v39 = vmul.f32 0.70710677, %v1346_v6  ;;  %v1502_v14 = vmul.f32 %v1470_v60, %v1374_v10  ;;  %v1350_v9 = vadd.f32 %v1349_v56, %v3515_v7  ;;  %v1380_v41 = vmul.f32 0.5, %v1344_v61  ;;  %v3608_v61 = vld [vmem:[%s3786_s6] ss:$0 sm:$0xff] }
 0x27b   : > { %2841 = verf.f32 %v1412_v12  ;;  %v1503_v57 = vmul.f32 %v1471_v40, %v1375_v63  ;;  %v1414_v2 = vmul.f32 0.70710677, %v1348_v0  ;;  %v1382_v48 = vmul.f32 0.5, %v1348_v0 }
 0x27c   : > { %2843 = verf.f32 %v1413_v39  ;;  %v1415_v19 = vmul.f32 0.70710677, %v1350_v9  ;;  %v1522_v34 = vpack.c.bf16 %v1502_v14, %v1500_v42  ;;  %v1381_v31 = vmul.f32 0.5, %v1346_v6 }
 0x27d   : > { %v2834_v5 = vpop.eup %2833  ;;  %2845 = verf.f32 %v1414_v2  ;;  %v1523_v33 = vpack.c.bf16 %v1503_v57, %v1501_v15  ;;  %v1383_v50 = vmul.f32 0.5, %v1350_v9 }
 0x27e   : > { %v2836_v43 = vpop.eup %2835  ;;  %v1472_v13 = vadd.f32 1.0, %v2834_v5  ;;  %2847 = verf.f32 %v1415_v19 }
 0x27f   : > { %v2838_v20 = vpop.eup %2837  ;;  %v1473_v22 = vadd.f32 1.0, %v2836_v43  ;;  %1735 = vmatprep.mubr.bf16.mxu1 %v1523_v33 }
 0x280   : > { %v2840_v51 = vpop.eup %2839  ;;  %v1474_v7 = vadd.f32 1.0, %v2838_v20  ;;  %1736 = vmatmul.mubr.bf16.gmra.mrb[36].mxu1 %v1522_v34  ;;  %v1504_v32 = vmul.f32 %v1472_v13, %v1376_v44 }
 0x281   : > { %v1475_v30 = vadd.f32 1.0, %v2840_v51  ;;  %v1505_v27 = vmul.f32 %v1473_v22, %v1377_v28 }
 0x282   : > { %v1506_v38 = vmul.f32 %v1474_v7, %v1378_v25 }
 0x283   : > { %v1507_v46 = vmul.f32 %v1475_v30, %v1379_v29 }
 0x284   : > { %v1524_v18 = vpack.c.bf16 %v1506_v38, %v1504_v32 }
 0x285   : > { %v2842_v17 = vpop.eup %2841  ;;  %v1525_v21 = vpack.c.bf16 %v1507_v46, %v1505_v27 }
 0x286   : > { %v2844_v24 = vpop.eup %2843  ;;  %v1476_v23 = vadd.f32 1.0, %v2842_v17 }
 0x287   : > { %v2846_v26 = vpop.eup %2845  ;;  %v1477_v47 = vadd.f32 1.0, %v2844_v24  ;;  %1743 = vmatprep.mubr.bf16.mxu1 %v1525_v21 }
 0x288   : > { %v2848_v35 = vpop.eup %2847  ;;  %v1478_v11 = vadd.f32 1.0, %v2846_v26  ;;  %1744 = vmatmul.mubr.bf16.gmra.mrb[40].mxu1 %v1524_v18  ;;  %v1508_v36 = vmul.f32 %v1476_v23, %v1380_v41 }
 0x289   : > { %v1479_v45 = vadd.f32 1.0, %v2848_v35  ;;  %v1509_v54 = vmul.f32 %v1477_v47, %v1381_v31 }
 0x28a   : > { %v1510_v49 = vmul.f32 %v1478_v11, %v1382_v48 }
 0x28b   : > { %v1511_v37 = vmul.f32 %v1479_v45, %v1383_v50 }
 0x28c   : > { %v1526_v55 = vpack.c.bf16 %v1510_v49, %v1508_v36 }
 0x28d   : > { %v1527_v16 = vpack.c.bf16 %v1511_v37, %v1509_v54 }
 0x28f   : > { %1751 = vmatprep.mubr.bf16.mxu1 %v1527_v16 }
 0x290   : > { %1752 = vmatmul.mubr.bf16.gmra.mrb[44].mxu1 %v1526_v55 }
 0x32b   : > { %v2384_v53 = vpop.f32.mrb[32].mxu0 }
 0x32c   : > { %v2385_v59 = vpop.f32.mrb[33].mxu0 }
 0x32d   : > { %v2386_v62 = vadd.f32 %v2385_v59, %v2384_v53  ;;  %v2387_v1 = vpop.f32.mrb[34].mxu0 }
 0x32e   : > { %v2388_v3 = vpop.f32.mrb[35].mxu0 }
 0x32f   : > { %v2389_v4 = vadd.f32 %v2388_v3, %v2387_v1  ;;  %v3611_v6 = vadd.f32 %v2386_v62, %v3608_v61 }
 0x331   : > { %v3614_v58 = vadd.f32 %v2389_v4, %v3608_v61  ;;  %v1760_v52 = vmul.f32 %v3611_v6, %v3611_v6 }
 0x333   : > { %v2390_v8 = vpop.f32.mrb[36].mxu0  ;;  %1776 = vadd.xlane.f32.xlu0 %v1760_v52  ;;  %v1761_v56 = vmul.f32 %v3614_v58, %v3614_v58 }
 0x334   : > { %v2391_v10 = vpop.f32.mrb[37].mxu0 }
 0x335   : > { %v2392_v60 = vadd.f32 %v2391_v10, %v2390_v8  ;;  %v2393_v12 = vpop.f32.mrb[38].mxu0 }
 0x336   : > { %v2394_v63 = vpop.f32.mrb[39].mxu0 }
 0x337   : > { %v2395_v40 = vadd.f32 %v2394_v63, %v2393_v12  ;;  %1778 = vadd.xlane.f32.xlu0 %v1761_v56  ;;  %v3621_v39 = vadd.f32 %v2392_v60, %v3608_v61 }
 0x339   : > { %v3624_v0 = vadd.f32 %v2395_v40, %v3608_v61  ;;  %v1762_v42 = vmul.f32 %v3621_v39, %v3621_v39 }
 0x33b   : > { %1780 = vadd.xlane.f32.xlu1 %v1762_v42  ;;  %v2396_v14 = vpop.f32.mrb[40].mxu0  ;;  %v1763_v15 = vmul.f32 %v3624_v0, %v3624_v0 }
 0x33c   : > { %v2397_v9 = vpop.f32.mrb[41].mxu0 }
 0x33d   : > { %v2398_v57 = vadd.f32 %v2397_v9, %v2396_v14  ;;  %v2399_v2 = vpop.f32.mrb[42].mxu0 }
 0x33e   : > { %v2400_v5 = vpop.f32.mrb[43].mxu0 }
 0x33f   : > { %1782 = vadd.xlane.f32.xlu1 %v1763_v15  ;;  %v3631_v19 = vadd.f32 %v2398_v57, %v3608_v61  ;;  %v2401_v34 = vadd.f32 %v2400_v5, %v2399_v2 }
 0x341   : > { %v3634_v43 = vadd.f32 %v2401_v34, %v3608_v61  ;;  %v1764_v33 = vmul.f32 %v3631_v19, %v3631_v19 }
 0x343   : > { %v2402_v13 = vpop.f32.mrb[44].mxu0  ;;  %1784 = vadd.xlane.f32.xlu0 %v1764_v33  ;;  %v1765_v20 = vmul.f32 %v3634_v43, %v3634_v43 }
 0x344   : > { %v2403_v22 = vpop.f32.mrb[45].mxu0 }
 0x345   : > { %v2404_v51 = vadd.f32 %v2403_v22, %v2402_v13  ;;  %v2405_v44 = vpop.f32.mrb[46].mxu0  ;;  %1786 = vadd.xlane.f32.xlu1 %v1765_v20 }
 0x346   : > { %v2406_v25 = vpop.f32.mrb[47].mxu0 }
 0x347   : > { %v3641_v7 = vadd.f32 %v2404_v51, %v3608_v61  ;;  %v2407_v28 = vadd.f32 %v2406_v25, %v2405_v44 }
 0x349   : > { %v3644_v29 = vadd.f32 %v2407_v28, %v3608_v61  ;;  %v1766_v30 = vmul.f32 %v3641_v7, %v3641_v7 }
 0x34b   : > { %v2408_v32 = vpop.f32.mrb[32].mxu1  ;;  %1788 = vadd.xlane.f32.xlu0 %v1766_v30  ;;  %v1767_v38 = vmul.f32 %v3644_v29, %v3644_v29 }
 0x34c   : > { %v2409_v27 = vpop.f32.mrb[33].mxu1 }
 0x34d   : > { %v2410_v46 = vadd.f32 %v2409_v27, %v2408_v32  ;;  %v2411_v17 = vpop.f32.mrb[34].mxu1  ;;  %1790 = vadd.xlane.f32.xlu1 %v1767_v38 }
 0x34e   : > { %v2412_v18 = vpop.f32.mrb[35].mxu1 }
 0x34f   : > { %v3651_v24 = vadd.f32 %v2410_v46, %v3608_v61  ;;  %v2413_v21 = vadd.f32 %v2412_v18, %v2411_v17 }
 0x351   : > { %v3654_v23 = vadd.f32 %v2413_v21, %v3608_v61  ;;  %v1768_v26 = vmul.f32 %v3651_v24, %v3651_v24 }
 0x353   : > { %v2414_v47 = vpop.f32.mrb[36].mxu1  ;;  %1792 = vadd.xlane.f32.xlu0 %v1768_v26  ;;  %v1769_v35 = vmul.f32 %v3654_v23, %v3654_v23 }
 0x354   : > { %v2415_v41 = vpop.f32.mrb[37].mxu1 }
 0x355   : > { %v2416_v48 = vadd.f32 %v2415_v41, %v2414_v47  ;;  %v2417_v11 = vpop.f32.mrb[38].mxu1  ;;  %1794 = vadd.xlane.f32.xlu1 %v1769_v35 }
 0x356   : > { %v2418_v31 = vpop.f32.mrb[39].mxu1 }
 0x357   : > { %v3661_v50 = vadd.f32 %v2416_v48, %v3608_v61  ;;  %v2419_v45 = vadd.f32 %v2418_v31, %v2417_v11 }
 0x359   : > { %v3664_v36 = vadd.f32 %v2419_v45, %v3608_v61  ;;  %v1770_v49 = vmul.f32 %v3661_v50, %v3661_v50 }
 0x35b   : > { %v2420_v54 = vpop.f32.mrb[40].mxu1  ;;  %1796 = vadd.xlane.f32.xlu0 %v1770_v49  ;;  %v1771_v37 = vmul.f32 %v3664_v36, %v3664_v36 }
 0x35c   : > { %v2421_v55 = vpop.f32.mrb[41].mxu1 }
 0x35d   : > { %v2422_v16 = vadd.f32 %v2421_v55, %v2420_v54  ;;  %v2423_v53 = vpop.f32.mrb[42].mxu1  ;;  %1798 = vadd.xlane.f32.xlu1 %v1771_v37 }
 0x35e   : > { %v2424_v59 = vpop.f32.mrb[43].mxu1 }
 0x35f   : > { %v3671_v62 = vadd.f32 %v2422_v16, %v3608_v61  ;;  %v2425_v1 = vadd.f32 %v2424_v59, %v2423_v53 }
 0x361   : > { %v3674_v3 = vadd.f32 %v2425_v1, %v3608_v61  ;;  %v1772_v4 = vmul.f32 %v3671_v62, %v3671_v62 }
 0x363   : > { %v2426_v52 = vpop.f32.mrb[44].mxu1  ;;  %1800 = vadd.xlane.f32.xlu0 %v1772_v4  ;;  %v1773_v8 = vmul.f32 %v3674_v3, %v3674_v3 }
 0x364   : > { %v2427_v10 = vpop.f32.mrb[45].mxu1 }
 0x365   : > { %v2428_v60 = vadd.f32 %v2427_v10, %v2426_v52  ;;  %v2429_v12 = vpop.f32.mrb[46].mxu1  ;;  %1802 = vadd.xlane.f32.xlu1 %v1773_v8 }
 0x366   : > { %v2430_v56 = vpop.f32.mrb[47].mxu1 }
 0x367   : > { %v3681_v63 = vadd.f32 %v2428_v60, %v3608_v61  ;;  %v2431_v40 = vadd.f32 %v2430_v56, %v2429_v12 }
 0x369   : > { %v3684_v42 = vadd.f32 %v2431_v40, %v3608_v61  ;;  %v1774_v14 = vmul.f32 %v3681_v63, %v3681_v63 }
 0x36b   : > { %1804 = vadd.xlane.f32.xlu0 %v1774_v14  ;;  %v1775_v9 = vmul.f32 %v3684_v42, %v3684_v42 }
 0x36d   : > { %1806 = vadd.xlane.f32.xlu1 %v1775_v9 }
 0x3c0   : > { %v1777_v15 = vpop.xlane.xlu0 %1776 }
 0x3c1   : > { %v1808_v57 = vmax.f32 %v1777_v15, 1e-24 }
 0x3c3   : > { %2849 = vrsqrt.f32 %v1808_v57 }
 0x3c4   : > { %v1779_v2 = vpop.xlane.xlu0 %1778 }
 0x3c5   : > { %v1809_v5 = vmax.f32 %v1779_v2, 1e-24 }
 0x3c7   : > { %2851 = vrsqrt.f32 %v1809_v5 }
 0x3c8   : > { %v1781_v34 = vpop.xlane.xlu1 %1780 }
 0x3c9   : > { %v1810_v33 = vmax.f32 %v1781_v34, 1e-24 }
 0x3cb   : > { %2853 = vrsqrt.f32 %v1810_v33 }
 0x3cc   : > { %v1783_v13 = vpop.xlane.xlu1 %1782 }
 0x3cd   : > { %v1811_v61 = vmax.f32 %v1783_v13, 1e-24  ;;  %v2850_v20 = vpop.eup %2849 }
 0x3ce   : > { %v1840_v44 = vmul.f32 %v2850_v20, %v3611_v6 }
 0x3cf   : > { %2855 = vrsqrt.f32 %v1811_v61 }
 0x3d0   : > { %v1785_v51 = vpop.xlane.xlu0 %1784 }
 0x3d1   : > { %v2852_v22 = vpop.eup %2851  ;;  %v1812_v28 = vmax.f32 %v1785_v51, 1e-24 }
 0x3d2   : > { %v1841_v25 = vmul.f32 %v2852_v22, %v3614_v58  ;;  %v1787_v30 = vpop.xlane.xlu1 %1786 }
 0x3d3   : > { %2857 = vrsqrt.f32 %v1812_v28  ;;  %v1813_v38 = vmax.f32 %v1787_v30, 1e-24 }
 0x3d4   : > { %v1856_v32 = vpack.c.bf16 %v1841_v25, %v1840_v44 }
 0x3d5   : > { %2859 = vrsqrt.f32 %v1813_v38  ;;  %v2854_v27 = vpop.eup %2853 }
 0x3d6   : > { %1864 = vst [vmem:[#allocation2] sm:$0xff] %v1856_v32  ;;  %v1842_v18 = vmul.f32 %v2854_v27, %v3621_v39 }
 0x3d8   : > { %v1789_v17 = vpop.xlane.xlu0 %1788 }
 0x3d9   : > { %v2856_v46 = vpop.eup %2855  ;;  %v1814_v26 = vmax.f32 %v1789_v17, 1e-24 }
 0x3da   : > { %v1843_v21 = vmul.f32 %v2856_v46, %v3624_v0  ;;  %v1791_v47 = vpop.xlane.xlu1 %1790 }
 0x3db   : > { %2861 = vrsqrt.f32 %v1814_v26  ;;  %v1815_v6 = vmax.f32 %v1791_v47, 1e-24 }
 0x3dc   : > { %v1857_v35 = vpack.c.bf16 %v1843_v21, %v1842_v18 }
 0x3dd   : > { %v2858_v58 = vpop.eup %2857  ;;  %2863 = vrsqrt.f32 %v1815_v6 }
 0x3de   : > { %1865 = vst [vmem:[#allocation2 + $0x8] sm:$0xff] %v1857_v35  ;;  %v1844_v48 = vmul.f32 %v2858_v58, %v3631_v19 }
 0x3df   : > { %v2860_v41 = vpop.eup %2859 }
 0x3e0   : > { %v1845_v11 = vmul.f32 %v2860_v41, %v3634_v43  ;;  %v1793_v31 = vpop.xlane.xlu0 %1792 }
 0x3e1   : > { %v1816_v45 = vmax.f32 %v1793_v31, 1e-24 }
 0x3e2   : > { %v1858_v49 = vpack.c.bf16 %v1845_v11, %v1844_v48  ;;  %v1795_v54 = vpop.xlane.xlu1 %1794 }
 0x3e3   : > { %2865 = vrsqrt.f32 %v1816_v45  ;;  %v1817_v39 = vmax.f32 %v1795_v54, 1e-24 }
 0x3e4   : > { %1866 = vst [vmem:[#allocation2 + $0x10] sm:$0xff] %v1858_v49 }
 0x3e5   : > { %v2862_v0 = vpop.eup %2861  ;;  %2867 = vrsqrt.f32 %v1817_v39 }
 0x3e6   : > { %v1846_v55 = vmul.f32 %v2862_v0, %v3641_v7 }
 0x3e7   : > { %v2864_v37 = vpop.eup %2863 }
 0x3e8   : > { %v1847_v16 = vmul.f32 %v2864_v37, %v3644_v29  ;;  %v1797_v53 = vpop.xlane.xlu0 %1796 }
 0x3e9   : > { %v1818_v59 = vmax.f32 %v1797_v53, 1e-24 }
 0x3ea   : > { %v1859_v1 = vpack.c.bf16 %v1847_v16, %v1846_v55  ;;  %v1799_v19 = vpop.xlane.xlu1 %1798 }
 0x3eb   : > { %2869 = vrsqrt.f32 %v1818_v59  ;;  %v1819_v43 = vmax.f32 %v1799_v19, 1e-24 }
 0x3ec   : > { %1867 = vst [vmem:[#allocation2 + $0x18] sm:$0xff] %v1859_v1 }
 0x3ed   : > { %v2866_v4 = vpop.eup %2865  ;;  %2871 = vrsqrt.f32 %v1819_v43 }
 0x3ee   : > { %v1848_v8 = vmul.f32 %v2866_v4, %v3651_v24 }
 0x3ef   : > { %v2868_v52 = vpop.eup %2867 }
 0x3f0   : > { %v1849_v10 = vmul.f32 %v2868_v52, %v3654_v23  ;;  %v1801_v60 = vpop.xlane.xlu0 %1800 }
 0x3f1   : > { %v1820_v12 = vmax.f32 %v1801_v60, 1e-24 }
 0x3f2   : > { %v1860_v56 = vpack.c.bf16 %v1849_v10, %v1848_v8  ;;  %v1803_v7 = vpop.xlane.xlu1 %1802 }
 0x3f3   : > { %2873 = vrsqrt.f32 %v1820_v12  ;;  %v1821_v29 = vmax.f32 %v1803_v7, 1e-24 }
 0x3f4   : > { %1868 = vst [vmem:[#allocation2 + $0x20] sm:$0xff] %v1860_v56 }
 0x3f5   : > { %v2870_v40 = vpop.eup %2869  ;;  %2875 = vrsqrt.f32 %v1821_v29 }
 0x3f6   : > { %v1850_v9 = vmul.f32 %v2870_v40, %v3661_v50 }
 0x3f7   : > { %v2872_v14 = vpop.eup %2871 }
 0x3f8   : > { %v1851_v15 = vmul.f32 %v2872_v14, %v3664_v36  ;;  %v1805_v57 = vpop.xlane.xlu0 %1804 }
 0x3f9   : > { %v1822_v2 = vmax.f32 %v1805_v57, 1e-24 }
 0x3fa   : > { %v1861_v5 = vpack.c.bf16 %v1851_v15, %v1850_v9  ;;  %v1807_v24 = vpop.xlane.xlu1 %1806 }
 0x3fb   : > { %2877 = vrsqrt.f32 %v1822_v2  ;;  %v1823_v23 = vmax.f32 %v1807_v24, 1e-24 }
 0x3fc   : > { %1869 = vst [vmem:[#allocation2 + $0x28] sm:$0xff] %v1861_v5 }
 0x3fd   : > { %v2874_v34 = vpop.eup %2873  ;;  %2879 = vrsqrt.f32 %v1823_v23 }
 0x3fe   : > { %v1852_v13 = vmul.f32 %v2874_v34, %v3671_v62 }
 0x3ff   : > { %v2876_v33 = vpop.eup %2875 }
 0x400   : > { %v1853_v61 = vmul.f32 %v2876_v33, %v3674_v3 }
 0x402   : > { %v1862_v20 = vpack.c.bf16 %v1853_v61, %v1852_v13 }
 0x404   : > { %1870 = vst [vmem:[#allocation2 + $0x30] sm:$0xff] %v1862_v20 }
 0x405   : > { %v2878_v22 = vpop.eup %2877 }
 0x406   : > { %v1854_v36 = vmul.f32 %v2878_v22, %v3681_v63 }
 0x407   : > { %v2880_v50 = vpop.eup %2879 }
 0x408   : > { %v1855_v51 = vmul.f32 %v2880_v50, %v3684_v42 }
 0x40a   : > { %v1863_v44 = vpack.c.bf16 %v1855_v51, %v1854_v36 }
 0x40c   : > { %1871 = vst [vmem:[#allocation2 + $0x38] sm:$0xff] %v1863_v44 }
 0x40d PF: > { %v2881_v25 = vld [vmem:[%s3114_s18] sm:$0xff]   ;;  %v2882_v28 = vld [vmem:[%s3114_s18 + $0x8] sm:$0xff]   ;;  %v2883_v62 = vld [vmem:[%s3114_s18 + $0x10] sm:$0xff]  }
 0x40e   : > { %2448 = vmatprep.subr.bf16.mxu0 %v2881_v25  ;;  %2496 = vmatprep.subr.bf16.mxu1 %v2881_v25  ;;  %v2884_v3 = vld [vmem:[%s3114_s18 + $0x18] sm:$0xff]   ;;  %v1872_v63 = vld [vmem:[#allocation2] sm:$0xff]  ;;  %v2886_v32 = vld [vmem:[%s3114_s18 + $0x28] sm:$0xff]  }
 0x40f   : > { %2449 = vmatpush3.bf16.msra.mxu0 %v2881_v25  ;;  %2504 = vmatpush3.bf16.msra.mxu1 %v2881_v25  ;;  %v1876_v42 = vld [vmem:[#allocation2 + $0x20] sm:$0xff]  ;;  %v2887_v38 = vld [vmem:[%s3114_s18 + $0x30] sm:$0xff]   ;;  %v2888_v27 = vld [vmem:[%s3114_s18 + $0x38] sm:$0xff]  }
 0x410   : > { %2450 = vmatprep.subr.bf16.mxu0 %v2882_v28  ;;  %2497 = vmatprep.subr.bf16.mxu1 %v2882_v28  ;;  %v2885_v30 = vld [vmem:[%s3114_s18 + $0x20] sm:$0xff]   ;;  %v1873_v46 = vld [vmem:[#allocation2 + $0x8] sm:$0xff]  ;;  %v1874_v18 = vld [vmem:[#allocation2 + $0x10] sm:$0xff]  ;;  %s2512_s18 = smul.u32 (%p3073_p9), 48, %s2947_s10 }
 0x411   : > { %2464 = vmatprep.mubr.bf16.mxu0 %v1872_v63  ;;  %2472 = vmatprep.mubr.bf16.mxu1 %v1876_v42  ;;  %v1877_v17 = vld [vmem:[#allocation2 + $0x28] sm:$0xff]  ;;  %v1878_v21 = vld [vmem:[#allocation2 + $0x30] sm:$0xff]  ;;  %v1875_v26 = vld [vmem:[#allocation2 + $0x18] sm:$0xff] }
 0x412   : > { %s2066_s23 = sadd.s32 (%p3073_p9), %s2943_s9, %s2512_s18 }
 0x413   : > { %2451 = vmatpush3.bf16.msra.mxu0 %v2882_v28  ;;  %2505 = vmatpush3.bf16.msra.mxu1 %v2882_v28  ;;  %v1879_v47 = vld [vmem:[#allocation2 + $0x38] sm:$0xff]  ;;  %s2364_s27 = sshll.u32 (%p3073_p9), %s2066_s23, 3 }
 0x414   : > { %2452 = vmatprep.subr.bf16.mxu0 %v2883_v62  ;;  %2498 = vmatprep.subr.bf16.mxu1 %v2883_v62  ;;  %s2068_s10 = scalar_lea.vmem (%p3073_p9), %s3788_s8, %s2364_s27 }
 0x417   : > { %2453 = vmatpush3.bf16.msra.mxu0 %v2883_v62  ;;  %2506 = vmatpush3.bf16.msra.mxu1 %v2883_v62 }
 0x418   : > { %2454 = vmatprep.subr.bf16.mxu0 %v2884_v3  ;;  %2499 = vmatprep.subr.bf16.mxu1 %v2884_v3 }
 0x41b   : > { %2455 = vmatpush3.bf16.msra.mxu0 %v2884_v3  ;;  %2507 = vmatpush3.bf16.msra.mxu1 %v2884_v3 }
 0x41c   : > { %2456 = vmatprep.subr.bf16.mxu0 %v2885_v30  ;;  %2500 = vmatprep.subr.bf16.mxu1 %v2885_v30 }
 0x41f   : > { %2457 = vmatpush3.bf16.msra.mxu0 %v2885_v30  ;;  %2508 = vmatpush3.bf16.msra.mxu1 %v2885_v30 }
 0x420   : > { %2458 = vmatprep.subr.bf16.mxu0 %v2886_v32  ;;  %2501 = vmatprep.subr.bf16.mxu1 %v2886_v32 }
 0x423   : > { %2459 = vmatpush3.bf16.msra.mxu0 %v2886_v32  ;;  %2509 = vmatpush3.bf16.msra.mxu1 %v2886_v32 }
 0x424   : > { %2460 = vmatprep.subr.bf16.mxu0 %v2887_v38  ;;  %2502 = vmatprep.subr.bf16.mxu1 %v2887_v38 }
 0x427   : > { %2461 = vmatpush3.bf16.msra.mxu0 %v2887_v38  ;;  %2510 = vmatpush3.bf16.msra.mxu1 %v2887_v38 }
 0x428   : > { %2462 = vmatprep.subr.bf16.mxu0 %v2888_v27  ;;  %2503 = vmatprep.subr.bf16.mxu1 %v2888_v27 }
 0x42b   : > { %2463 = vmatpush3.bf16.msra.mxu0 %v2888_v27  ;;  %2511 = vmatpush3.bf16.msra.mxu1 %v2888_v27 }
 0x42e   : > { %2465 = vmatmul.mubr.bf16.vlgmr.msra.gmra.mrb[0].mxu0 %v1873_v46  ;;  %2473 = vmatmul.mubr.bf16.vlgmr.msra.gmra.mrb[0].mxu1 %v1877_v17 }
 0x42f   : > { %2468 = vmatprep.mubr.bf16.mxu0 %v1874_v18  ;;  %2476 = vmatprep.mubr.bf16.mxu1 %v1878_v21 }
 0x436   : > { %2469 = vmatmul.mubr.bf16.gmra.mrb[4].mxu0 %v1875_v26  ;;  %2477 = vmatmul.mubr.bf16.gmra.mrb[4].mxu1 %v1879_v47 }
 0x501   : > { %v2466_v35 = vpop.f32.mrb[0].mxu0  ;;  %v2474_v6 = vpop.f32.mrb[0].mxu1 }
 0x502   : > { %2043 = vst [vmem:[%s3116_s7 + $0x10] sm:$0xff] %v2466_v35  ;;  %2051 = vst [vmem:[%s3116_s7 + $0x50] sm:$0xff] %v2474_v6  ;;  %v1978_v58 = vpop.f32.mrb[1].mxu0  ;;  %v2010_v41 = vpop.f32.mrb[1].mxu1 }
 0x503   : > { %2041 = vst [vmem:[%s3116_s7] sm:$0xff] %v1978_v58  ;;  %2049 = vst [vmem:[%s3116_s7 + $0x40] sm:$0xff] %v2010_v41  ;;  %v2467_v48 = vpop.f32.mrb[2].mxu0  ;;  %v2475_v11 = vpop.f32.mrb[2].mxu1 }
 0x504   : > { %2044 = vst [vmem:[%s3116_s7 + $0x18] sm:$0xff] %v2467_v48  ;;  %2052 = vst [vmem:[%s3116_s7 + $0x58] sm:$0xff] %v2475_v11  ;;  %v1981_v31 = vpop.f32.mrb[3].mxu0  ;;  %v2013_v45 = vpop.f32.mrb[3].mxu1 }
 0x505   : > { %2042 = vst [vmem:[%s3116_s7 + $0x8] sm:$0xff] %v1981_v31  ;;  %2050 = vst [vmem:[%s3116_s7 + $0x48] sm:$0xff] %v2013_v45 }
 0x507   : > { %2063 = sbr.rel (!%p3073_p9) target bundleno = 1303 (0x517), region = 101 }
 0x509   : > { %v2470_v49 = vpop.f32.mrb[4].mxu0  ;;  %v2478_v54 = vpop.f32.mrb[4].mxu1  ;;  %v2130_v19 = vld [vmem:[%s3116_s7 + $0x10] sm:$0xff] (%p3073_p9) }
 0x50a   : > { %2047 = vst [vmem:[%s3116_s7 + $0x30] sm:$0xff] %v2470_v49  ;;  %2055 = vst [vmem:[%s3116_s7 + $0x70] sm:$0xff] %v2478_v54  ;;  %v1994_v39 = vpop.f32.mrb[5].mxu0  ;;  %v2026_v0 = vpop.f32.mrb[5].mxu1  ;;  %v2126_v59 = vld [vmem:[%s3116_s7] sm:$0xff] (%p3073_p9)  ;;  %v2146_v56 = vld [vmem:[%s3116_s7 + $0x50] sm:$0xff] (%p3073_p9) }
 0x50b   : > { %2045 = vst [vmem:[%s3116_s7 + $0x20] sm:$0xff] %v1994_v39  ;;  %2053 = vst [vmem:[%s3116_s7 + $0x60] sm:$0xff] %v2026_v0  ;;  %v2471_v37 = vpop.f32.mrb[6].mxu0  ;;  %v2479_v55 = vpop.f32.mrb[6].mxu1  ;;  %v2132_v43 = vld [vmem:[%s3116_s7 + $0x18] sm:$0xff] (%p3073_p9)  ;;  %v2142_v60 = vld [vmem:[%s3116_s7 + $0x40] sm:$0xff] (%p3073_p9) }
 0x50c   : > { %2048 = vst [vmem:[%s3116_s7 + $0x38] sm:$0xff] %v2471_v37  ;;  %2056 = vst [vmem:[%s3116_s7 + $0x78] sm:$0xff] %v2479_v55  ;;  %v1997_v16 = vpop.f32.mrb[7].mxu0  ;;  %v2029_v53 = vpop.f32.mrb[7].mxu1  ;;  %v2128_v1 = vld [vmem:[%s3116_s7 + $0x8] sm:$0xff] (%p3073_p9)  ;;  %v2148_v7 = vld [vmem:[%s3116_s7 + $0x58] sm:$0xff] (%p3073_p9) }
 0x50d   : > { %2046 = vst [vmem:[%s3116_s7 + $0x28] sm:$0xff] %v1997_v16  ;;  %2054 = vst [vmem:[%s3116_s7 + $0x68] sm:$0xff] %v2029_v53  ;;  %v2144_v12 = vld [vmem:[%s3116_s7 + $0x48] sm:$0xff] (%p3073_p9) }
 0x50e   : > { %2127 = vst [vmem:[%s2068_s10] sm:$0xff] %v2126_v59  ;;  %2129 = vst [vmem:[%s2068_s10 + $0x18] sm:$0xff] %v2128_v1 }
 0x50f   : > { %2131 = vst [vmem:[%s2068_s10 + $0x30] sm:$0xff] %v2130_v19  ;;  %2133 = vst [vmem:[%s2068_s10 + $0x48] sm:$0xff] %v2132_v43 }
 0x510   : > { %2143 = vst [vmem:[%s2068_s10 + $0xc0] sm:$0xff] %v2142_v60  ;;  %2145 = vst [vmem:[%s2068_s10 + $0xd8] sm:$0xff] %v2144_v12 }
 0x511   : > { %v2138_v8 = vld [vmem:[%s3116_s7 + $0x30] sm:$0xff]  ;;  %2147 = vst [vmem:[%s2068_s10 + $0xf0] sm:$0xff] %v2146_v56  ;;  %2149 = vst [vmem:[%s2068_s10 + $0x108] sm:$0xff] %v2148_v7 }
 0x512   : > { %v2134_v4 = vld [vmem:[%s3116_s7 + $0x20] sm:$0xff]  ;;  %v2154_v14 = vld [vmem:[%s3116_s7 + $0x70] sm:$0xff]  ;;  %2139 = vst [vmem:[%s2068_s10 + $0x90] sm:$0xff] %v2138_v8 }
 0x513   : > { %v2140_v10 = vld [vmem:[%s3116_s7 + $0x38] sm:$0xff]  ;;  %v2150_v29 = vld [vmem:[%s3116_s7 + $0x60] sm:$0xff]  ;;  %2135 = vst [vmem:[%s2068_s10 + $0x60] sm:$0xff] %v2134_v4  ;;  %2155 = vst [vmem:[%s2068_s10 + $0x150] sm:$0xff] %v2154_v14 }
 0x514   : > { %v2136_v52 = vld [vmem:[%s3116_s7 + $0x28] sm:$0xff]  ;;  %2141 = vst [vmem:[%s2068_s10 + $0xa8] sm:$0xff] %v2140_v10  ;;  %2151 = vst [vmem:[%s2068_s10 + $0x120] sm:$0xff] %v2150_v29  ;;  %v2156_v9 = vld [vmem:[%s3116_s7 + $0x78] sm:$0xff] }
 0x515   : > { %v2152_v40 = vld [vmem:[%s3116_s7 + $0x68] sm:$0xff]  ;;  %2137 = vst [vmem:[%s2068_s10 + $0x78] sm:$0xff] %v2136_v52  ;;  %2157 = vst [vmem:[%s2068_s10 + $0x168] sm:$0xff] %v2156_v9 }
 0x516   : > { %2153 = vst [vmem:[%s2068_s10 + $0x138] sm:$0xff] %v2152_v40 }
 0x517 PF: > { %s18_s13 = sadd.s32 1, %s2959_s13   ;;  %s3796_s16 = sld [smem:[#allocation5_spill]] }
 0x518   : > { %p15_p2 = scmp.ge.s32.totalorder %s18_s13, 8   ;;  %s3797_s22 = sld [smem:[#allocation6_spill]] }
 0x519   : > { %s3798_s27 = smov %s2931_s28  ;;  %s3799_s28 = smov %s3078_s24 }
 0x51a   : > { %s3800_s29 = smov %s2939_s30  ;;  %s3801_s30 = smov %s3067_s20 }
 0x51b   : > { %s3802_s9 = smov %s2951_s11  ;;  %s3803_s10 = smov %s2955_s12 }
 0x51c   :  { %17 = sbr.rel (!%p15_p2) target bundleno = 7 (0x7), region = 173 }
 0x51d   : > { %s3804_s11 = smov %s3796_s16 }
 0x51e   : > { %s3805_s12 = smov %s3797_s22 }

</bundles_post_ra>
